<compile_context>
chip_gen: v5e
topology: v5e:2x2
jax: 0.10.0
libtpu: 0.0.40
codegen_flags: <defaults>
</compile_context>

<pallas_src>
import jax
import jax.numpy as jnp
from jax.experimental import pallas as pl
from jax.experimental.pallas import tpu as pltpu

# ---- module hyper-parameters (small, consistent with the module) ----
IMAGE_SIZE = 16
PATCH_SIZE = 4
NUM_CHANNELS = 4
HIDDEN_SIZE = 32
NUM_PATCHES = (IMAGE_SIZE // PATCH_SIZE) ** 2          # 16


def _patch_embed_kernel(x_ref, g_ref, b_ref, o_ref):
    """One batch-block per grid step.

    x_ref: (TB, C*H*W)            flattened NCHW images (lane-dense rows)
    g_ref: (C*H*W, nH*nW*hidden)  packed block-diagonal projection weight (resident)
    b_ref: (1, nH*nW*hidden)      bias tiled once per patch (resident)
    o_ref: (TB, nH*nW*hidden)     flat, lane-dense output block
    """
    o_ref[...] = (
        jnp.dot(x_ref[...], g_ref[...], preferred_element_type=jnp.float32)
        + b_ref[...]
    ).astype(o_ref.dtype)


def pack_params(weight, bias, img_size):
    """One-time ("init") packing of Conv2d OIHW params into dense kernel operands.

    G[c*H*W + (i*P+ph)*W + j*P + pw, (i2*nW + j2)*hidden + h]
        = weight[h, c, ph, pw] * (i == i2) * (j == j2)
    b_tiled[0, (i*nW + j)*hidden + h] = bias[h]
    """
    hidden, C, P, P2 = weight.shape
    assert P == P2
    nH = nW = img_size // P
    H = W = img_size
    eye_h = jnp.eye(nH, dtype=weight.dtype)
    eye_w = jnp.eye(nW, dtype=weight.dtype)
    # dims: c, i(row block), q(=ph), j(col block), p(=pw), m(=i2), n(=j2), h
    g8 = jnp.einsum("hcqp,im,jn->ciqjpmnh", weight, eye_h, eye_w)
    g = g8.reshape(C * H * W, nH * nW * hidden)            # (1024, 512) here
    b = jnp.tile(bias, nH * nW).reshape(1, nH * nW * hidden)  # (1, 512)
    return g, b


def patch_embeddings(x, g_packed, b_packed, patch_size=PATCH_SIZE):
    """x: (B, C, H, W) NCHW; g_packed/b_packed from pack_params."""
    B, C, H, W = x.shape
    P = patch_size
    nH, nW = H // P, W // P
    K, M = g_packed.shape                     # K = C*H*W, M = nH*nW*hidden
    hidden = M // (nH * nW)

    # Free row-major reshape: NCHW -> (B, C*H*W) keeps memory layout unchanged.
    x_flat = x.reshape(B, K)

    # Batch tile: whole batch for toy B; capped at 256 (multiple of 8 sublanes,
    # M-dim >= 256 fills a full MXU pass and keeps grid length >= 2 on large B
    # so the "parallel" axis can shard across v7x's two TensorCores).
    TB = B if B <= 256 else 256
    grid = (pl.cdiv(B, TB),)

    out_flat = pl.pallas_call(
        _patch_embed_kernel,
        out_shape=jax.ShapeDtypeStruct((B, M), x.dtype),
        grid_spec=pltpu.PrefetchScalarGridSpec(
            num_scalar_prefetch=0,
            grid=grid,
            in_specs=[
                pl.BlockSpec((TB, K), lambda b: (b, 0)),   # batch-blocked input
                pl.BlockSpec((K, M), lambda b: (0, 0)),    # resident packed weight
                pl.BlockSpec((1, M), lambda b: (0, 0)),    # resident bias
            ],
            out_specs=pl.BlockSpec((TB, M), lambda b: (b, 0)),
        ),
        compiler_params=pltpu.CompilerParams(
            dimension_semantics=("parallel",)),
    )(x_flat, g_packed, b_packed)

    # (B, nH*nW*hidden) -> (B, num_patches, hidden): pure row-major reshape (free).
    return out_flat.reshape(B, nH * nW, hidden)


if __name__ == "__main__":
    key = jax.random.PRNGKey(0)
    kx, kw, kb = jax.random.split(key, 3)

    B = 2
    x = jax.random.normal(kx, (B, NUM_CHANNELS, IMAGE_SIZE, IMAGE_SIZE),
                          dtype=jnp.float32)
    weight = jax.random.normal(
        kw, (HIDDEN_SIZE, NUM_CHANNELS, PATCH_SIZE, PATCH_SIZE),
        dtype=jnp.float32) * 0.02
    bias = jax.random.normal(kb, (HIDDEN_SIZE,), dtype=jnp.float32) * 0.02

    # Weight packing happens once, outside the per-call hot path.
    g_packed, b_packed = pack_params(weight, bias, IMAGE_SIZE)

    out = patch_embeddings(x, g_packed, b_packed)
    out = jax.block_until_ready(out)

    # Reference: strided conv via lax, then flatten(2).transpose(1, 2).
    ref = jax.lax.conv_general_dilated(
        x, weight, window_strides=(PATCH_SIZE, PATCH_SIZE), padding="VALID",
        dimension_numbers=("NCHW", "OIHW", "NCHW"))
    ref = ref + bias.reshape(1, HIDDEN_SIZE, 1, 1)
    ref = ref.reshape(B, HIDDEN_SIZE, NUM_PATCHES).transpose(0, 2, 1)

    assert out.shape == (B, NUM_PATCHES, HIDDEN_SIZE), out.shape
    err = float(jnp.max(jnp.abs(out - ref)))
    assert err < 1e-3, err
    print("KERNEL_OK")
</pallas_src>

<mosaic_0001>
module attributes {stable_mosaic.version = 11 : i64} {
  func.func @_patch_embed_kernel(%arg0: i32, %arg1: memref<2x1024xf32, #tpu.memory_space<vmem>>, %arg2: memref<1024x512xf32, #tpu.memory_space<vmem>>, %arg3: memref<1x512xf32, #tpu.memory_space<vmem>>, %arg4: memref<2x512xf32, #tpu.memory_space<vmem>>) attributes {dimension_semantics = [#tpu.dimension_semantics<parallel>], iteration_bounds = array<i64: 1>, scalar_prefetch = 0 : i64, scratch_operands = 0 : i64, tpu.core_type = #tpu.core_type<tc>, window_params = [{transform_indices = @transform_0, window_bounds = array<i64: 2, 1024>}, {pipeline_mode = #tpu.pipeline_mode<synchronous>, transform_indices = @transform_1, window_bounds = array<i64: 1024, 512>}, {pipeline_mode = #tpu.pipeline_mode<synchronous>, transform_indices = @transform_2, window_bounds = array<i64: 1, 512>}, {transform_indices = @transform_3, window_bounds = array<i64: 2, 512>}]} {
    %c0 = arith.constant 0 : index
    %c0_0 = arith.constant 0 : index
    %0 = vector.load %arg1[%c0, %c0_0] : memref<2x1024xf32, #tpu.memory_space<vmem>>, vector<2x1024xf32>
    %c0_1 = arith.constant 0 : index
    %c0_2 = arith.constant 0 : index
    %1 = vector.load %arg2[%c0_1, %c0_2] : memref<1024x512xf32, #tpu.memory_space<vmem>>, vector<1024x512xf32>
    %cst = arith.constant dense<0.000000e+00> : vector<2x512xf32>
    %2 = tpu.matmul %0, %1, %cst {dimension_numbers = #tpu.dot_dimension_numbers<[1], [0], [0], [1], [0, 0, 1, 1], [], []>} : vector<2x1024xf32>, vector<1024x512xf32>, vector<2x512xf32> -> vector<2x512xf32>
    %c0_3 = arith.constant 0 : index
    %c0_4 = arith.constant 0 : index
    %3 = vector.load %arg3[%c0_3, %c0_4] : memref<1x512xf32, #tpu.memory_space<vmem>>, vector<1x512xf32>
    %4 = vector.broadcast %3 : vector<1x512xf32> to vector<2x512xf32>
    %5 = arith.addf %2, %4 : vector<2x512xf32>
    %c0_5 = arith.constant 0 : index
    %c0_6 = arith.constant 0 : index
    %6 = vector.load %arg4[%c0_5, %c0_6] : memref<2x512xf32, #tpu.memory_space<vmem>>, vector<2x512xf32>
    tpu.vector_store %arg4[%c0_5, %c0_6], %5 {strides = array<i32>} : memref<2x512xf32, #tpu.memory_space<vmem>>, vector<2x512xf32>,
    return
  }
  func.func @transform_0(%arg0: i32) -> (i32, i32) {
    %c0_i32 = arith.constant 0 : i32
    %c0_i32_0 = arith.constant 0 : i32
    return %arg0, %c0_i32 : i32, i32
  }
  func.func @transform_1(%arg0: i32) -> (i32, i32) {
    %c0_i32 = arith.constant 0 : i32
    %c0_i32_0 = arith.constant 0 : i32
    %c0_i32_1 = arith.constant 0 : i32
    return %c0_i32, %c0_i32_0 : i32, i32
  }
  func.func @transform_2(%arg0: i32) -> (i32, i32) {
    %c0_i32 = arith.constant 0 : i32
    %c0_i32_0 = arith.constant 0 : i32
    %c0_i32_1 = arith.constant 0 : i32
    return %c0_i32, %c0_i32_0 : i32, i32
  }
  func.func @transform_3(%arg0: i32) -> (i32, i32) {
    %c0_i32 = arith.constant 0 : i32
    %c0_i32_0 = arith.constant 0 : i32
    return %arg0, %c0_i32 : i32, i32
  }
}

</mosaic_0001>

<bundles_post_ra>
// kernel: tpu_custom_call.1
= control target key start
LH: loop header
LB: loop body
LE: loop exit
PB: predicated region body
PF: predicated region fallthrough
CT: control target
= control target key end

     0   :  { %8 = vsyncpa [#allocation3], 0  ;;  %s1497_s0 = inlined_call_operand.hbm [shape: f32[2,1024], index: 0, kind: input, shape index: {}]   ;;  %s1498_s1 = inlined_call_operand.hbm [shape: f32[1024,512], index: 1, kind: input, shape index: {}]   ;;  %s1499_s2 = inlined_call_operand.hbm [shape: f32[1,512], index: 2, kind: input, shape index: {}]   ;;  %s1500_s3 = inlined_call_operand.hbm [shape: f32[2,512], index: 3, kind: output, shape index: {}]  }
   0x1   :  { %9 = vsyncpa [#allocation6], 0  ;;  %s26_s14 = sshll.u32 %s1498_s1, 4  ;;  %s27_s14 = int_to_ptr.hbm [resolvable:$true] %s26_s14 }
   0x2   :  { %10 = vsyncpa [#allocation4], 0  ;;  %s1392_s15 = smov [#allocation5]   ;;  %s16_s19 = sshll.u32 %s1497_s0, 4  ;;  %s17_s19 = int_to_ptr.hbm [resolvable:$true] %s16_s19 }
   0x3   :  { %s28_s16 = sshll.u32 %s1392_s15, 4  ;;  %s1393_s20 = smov 512   ;;  %s29_s16 = int_to_ptr.vmem [resolvable:$true] %s28_s16 }
   0x4   :  { %s1394_s21 = smov 32   ;;  %s1395_s22 = smov [#allocation2]  }
   0x5   :  { %34 = dma.hbm_to_vmem [thread:$0]  %s27_s14, 65536, %s29_s16, [#allocation6], %s1393_s20, %s1393_s20, %s1394_s21  }
   0x6   :  { %s18_s23 = sshll.u32 %s1395_s22, 4  ;;  %s40_s26 = sshll.u32 %s1499_s2, 4  ;;  %s19_s23 = int_to_ptr.vmem [resolvable:$true] %s18_s23  ;;  %s41_s26 = int_to_ptr.hbm [resolvable:$true] %s40_s26 }
   0x7   :  { %21 = dma.hbm_to_vmem [thread:$0]  %s17_s19, 256, %s19_s23, [#allocation3]  }
   0x8   :  { %s1396_s1 = smov [#allocation7]  }
   0x9   :  { %s42_s27 = sshll.u32 %s1396_s1, 4  ;;  %s43_s27 = int_to_ptr.vmem [resolvable:$true] %s42_s27 }
   0xa   :  { %45 = dma.hbm_to_vmem [thread:$0]  %s41_s26, 64, %s43_s27, [#allocation6]  }
   0xb   :  { %1386 = dma.done.wait [#allocation3], 256  }
   0xc   :  { %1387 = vsyncadd [#allocation3], 4294967040 }
   0xd   :  { %1388 = dma.done.wait [#allocation6], 65600  }
   0xe   :  { %1389 = vsyncadd [#allocation6], 4294901696  ;;  %v248_v0 = vld [vmem:[#allocation5 + $0x5e0] sm:$0xff]  ;;  %vm1250_vm0 = vcmask 1041408   ;;  %vm1252_vm1 = vcmask 1045508   ;;  %s1397_s0 = smov [#allocation8]  }
   0xf   :  { %v120_v1 = vld [vmem:[#allocation5 + $0x1e0] sm:$0xff]  ;;  %643 = vmatpush.msra.mxu2 %v248_v0  ;;  %s1263_s2 = sshll.u32 %s1397_s0, 4  ;;  %s1265_s30 = sshll.u32 %s1500_s3, 4  ;;  %vm1254_vm2 = vcmask 1043456   ;;  %s1264_s2 = int_to_ptr.vmem [resolvable:$true] %s1263_s2  ;;  %s1266_s30 = int_to_ptr.hbm [resolvable:$true] %s1265_s30 }
  0x10   :  { %v244_v2 = vld [vmem:[#allocation5 + $0x5c0] sm:$0xff]  ;;  %603 = vmatpush.msra.mxu0 %v120_v1 }
  0x11   :  { %v312_v3 = vld [vmem:[#allocation5 + $0x7e0] sm:$0xff]  ;;  %644 = vmatpush.msra.mxu2 %v244_v2 }
  0x12   :  { %v116_v4 = vld [vmem:[#allocation5 + $0x1c0] sm:$0xff]  ;;  %663 = vmatpush.msra.mxu3 %v312_v3 }
  0x13   :  { %v184_v5 = vld [vmem:[#allocation5 + $0x3e0] sm:$0xff]  ;;  %604 = vmatpush.msra.mxu0 %v116_v4 }
  0x14   :  { %623 = vmatpush.msra.mxu1 %v184_v5  ;;  %v240_v6 = vld [vmem:[#allocation5 + $0x5a0] sm:$0xff] }
  0x15   :  { %v308_v7 = vld [vmem:[#allocation5 + $0x7c0] sm:$0xff]  ;;  %645 = vmatpush.msra.mxu2 %v240_v6 }
  0x16   :  { %v112_v8 = vld [vmem:[#allocation5 + $0x1a0] sm:$0xff]  ;;  %664 = vmatpush.msra.mxu3 %v308_v7 }
  0x17   :  { %v180_v9 = vld [vmem:[#allocation5 + $0x3c0] sm:$0xff]  ;;  %605 = vmatpush.msra.mxu0 %v112_v8 }
  0x18   :  { %v304_v10 = vld [vmem:[#allocation5 + $0x7a0] sm:$0xff]  ;;  %624 = vmatpush.msra.mxu1 %v180_v9 }
  0x19   :  { %v236_v11 = vld [vmem:[#allocation5 + $0x580] sm:$0xff]  ;;  %665 = vmatpush.msra.mxu3 %v304_v10 }
  0x1a   :  { %v108_v12 = vld [vmem:[#allocation5 + $0x180] sm:$0xff]  ;;  %646 = vmatpush.msra.mxu2 %v236_v11 }
  0x1b   :  { %v176_v13 = vld [vmem:[#allocation5 + $0x3a0] sm:$0xff]  ;;  %606 = vmatpush.msra.mxu0 %v108_v12 }
  0x1c   :  { %v300_v14 = vld [vmem:[#allocation5 + $0x780] sm:$0xff]  ;;  %625 = vmatpush.msra.mxu1 %v176_v13 }
  0x1d   :  { %v172_v15 = vld [vmem:[#allocation5 + $0x380] sm:$0xff]  ;;  %666 = vmatpush.msra.mxu3 %v300_v14 }
  0x1e   :  { %v232_v16 = vld [vmem:[#allocation5 + $0x560] sm:$0xff]  ;;  %626 = vmatpush.msra.mxu1 %v172_v15 }
  0x1f   :  { %v104_v17 = vld [vmem:[#allocation5 + $0x160] sm:$0xff]  ;;  %647 = vmatpush.msra.mxu2 %v232_v16 }
  0x20   :  { %v296_v18 = vld [vmem:[#allocation5 + $0x760] sm:$0xff]  ;;  %607 = vmatpush.msra.mxu0 %v104_v17 }
  0x21   :  { %v168_v19 = vld [vmem:[#allocation5 + $0x360] sm:$0xff]  ;;  %667 = vmatpush.msra.mxu3 %v296_v18 }
  0x22   :  { %v228_v20 = vld [vmem:[#allocation5 + $0x540] sm:$0xff]  ;;  %627 = vmatpush.msra.mxu1 %v168_v19 }
  0x23   :  { %v100_v21 = vld [vmem:[#allocation5 + $0x140] sm:$0xff]  ;;  %648 = vmatpush.msra.mxu2 %v228_v20 }
  0x24   :  { %v292_v22 = vld [vmem:[#allocation5 + $0x740] sm:$0xff]  ;;  %608 = vmatpush.msra.mxu0 %v100_v21 }
  0x25   :  { %v164_v23 = vld [vmem:[#allocation5 + $0x340] sm:$0xff]  ;;  %668 = vmatpush.msra.mxu3 %v292_v22 }
  0x26   :  { %v224_v24 = vld [vmem:[#allocation5 + $0x520] sm:$0xff]  ;;  %628 = vmatpush.msra.mxu1 %v164_v23 }
  0x27   :  { %v96_v25 = vld [vmem:[#allocation5 + $0x120] sm:$0xff]  ;;  %649 = vmatpush.msra.mxu2 %v224_v24  ;;  %v58_v24 = vld [vmem:[#allocation2] sm:$0xff] }
  0x28   :  { %v288_v26 = vld [vmem:[#allocation5 + $0x720] sm:$0xff]  ;;  %609 = vmatpush.msra.mxu0 %v96_v25  ;;  %584 = vst [vmem:[#allocation1] ss:$4 sm:$0xff] %v58_v24 }
  0x29   :  { %v160_v27 = vld [vmem:[#allocation5 + $0x320] sm:$0xff]  ;;  %669 = vmatpush.msra.mxu3 %v288_v26 }
  0x2a   :  { %v220_v28 = vld [vmem:[#allocation5 + $0x500] sm:$0xff]  ;;  %629 = vmatpush.msra.mxu1 %v160_v27 }
  0x2b   :  { %v92_v29 = vld [vmem:[#allocation5 + $0x100] sm:$0xff]  ;;  %650 = vmatpush.msra.mxu2 %v220_v28 }
  0x2c   :  { %v284_v30 = vld [vmem:[#allocation5 + $0x700] sm:$0xff]  ;;  %610 = vmatpush.msra.mxu0 %v92_v29 }
  0x2d   :  { %v156_v31 = vld [vmem:[#allocation5 + $0x300] sm:$0xff]  ;;  %670 = vmatpush.msra.mxu3 %v284_v30 }
  0x2e   :  { %v216_v32 = vld [vmem:[#allocation5 + $0x4e0] sm:$0xff]  ;;  %630 = vmatpush.msra.mxu1 %v156_v31 }
  0x2f   :  { %v88_v33 = vld [vmem:[#allocation5 + $0xe0] sm:$0xff]  ;;  %651 = vmatpush.msra.mxu2 %v216_v32 }
  0x30   :  { %v280_v34 = vld [vmem:[#allocation5 + $0x6e0] sm:$0xff]  ;;  %611 = vmatpush.msra.mxu0 %v88_v33 }
  0x31   :  { %v152_v35 = vld [vmem:[#allocation5 + $0x2e0] sm:$0xff]  ;;  %671 = vmatpush.msra.mxu3 %v280_v34 }
  0x32   :  { %v212_v36 = vld [vmem:[#allocation5 + $0x4c0] sm:$0xff]  ;;  %631 = vmatpush.msra.mxu1 %v152_v35 }
  0x33   :  { %v84_v37 = vld [vmem:[#allocation5 + $0xc0] sm:$0xff]  ;;  %652 = vmatpush.msra.mxu2 %v212_v36 }
  0x34   :  { %v276_v38 = vld [vmem:[#allocation5 + $0x6c0] sm:$0xff]  ;;  %612 = vmatpush.msra.mxu0 %v84_v37  ;;  %v59_v37 = vld [vmem:[#allocation2 + $0x8] sm:$0xff] }
  0x35   :  { %v148_v39 = vld [vmem:[#allocation5 + $0x2c0] sm:$0xff]  ;;  %672 = vmatpush.msra.mxu3 %v276_v38  ;;  %586 = vst [vmem:[#allocation1 + $0x20] ss:$4 sm:$0xff] %v59_v37  ;;  %v289_v37 = vld [vmem:[#allocation5 + $0x728] sm:$0xff] }
  0x36   :  { %v208_v40 = vld [vmem:[#allocation5 + $0x4a0] sm:$0xff]  ;;  %632 = vmatpush.msra.mxu1 %v148_v39 }
  0x37   :  { %v80_v41 = vld [vmem:[#allocation5 + $0xa0] sm:$0xff]  ;;  %653 = vmatpush.msra.mxu2 %v208_v40 }
  0x38   :  { %v272_v42 = vld [vmem:[#allocation5 + $0x6a0] sm:$0xff]  ;;  %613 = vmatpush.msra.mxu0 %v80_v41 }
  0x39   :  { %v144_v43 = vld [vmem:[#allocation5 + $0x2a0] sm:$0xff]  ;;  %673 = vmatpush.msra.mxu3 %v272_v42 }
  0x3a   :  { %v204_v44 = vld [vmem:[#allocation5 + $0x480] sm:$0xff]  ;;  %633 = vmatpush.msra.mxu1 %v144_v43 }
  0x3b   :  { %v76_v45 = vld [vmem:[#allocation5 + $0x80] sm:$0xff]  ;;  %654 = vmatpush.msra.mxu2 %v204_v44 }
  0x3c   :  { %v268_v46 = vld [vmem:[#allocation5 + $0x680] sm:$0xff]  ;;  %614 = vmatpush.msra.mxu0 %v76_v45 }
  0x3d   :  { %v140_v47 = vld [vmem:[#allocation5 + $0x280] sm:$0xff]  ;;  %674 = vmatpush.msra.mxu3 %v268_v46 }
  0x3e   :  { %v200_v48 = vld [vmem:[#allocation5 + $0x460] sm:$0xff]  ;;  %634 = vmatpush.msra.mxu1 %v140_v47 }
  0x3f   :  { %v72_v49 = vld [vmem:[#allocation5 + $0x60] sm:$0xff]  ;;  %655 = vmatpush.msra.mxu2 %v200_v48 }
  0x40   :  { %v264_v50 = vld [vmem:[#allocation5 + $0x660] sm:$0xff]  ;;  %615 = vmatpush.msra.mxu0 %v72_v49 }
  0x41   :  { %v136_v51 = vld [vmem:[#allocation5 + $0x260] sm:$0xff]  ;;  %675 = vmatpush.msra.mxu3 %v264_v50 }
  0x42   :  { %v196_v52 = vld [vmem:[#allocation5 + $0x440] sm:$0xff]  ;;  %635 = vmatpush.msra.mxu1 %v136_v51 }
  0x43   :  { %v68_v53 = vld [vmem:[#allocation5 + $0x40] sm:$0xff]  ;;  %656 = vmatpush.msra.mxu2 %v196_v52 }
  0x44   :  { %v260_v54 = vld [vmem:[#allocation5 + $0x640] sm:$0xff]  ;;  %616 = vmatpush.msra.mxu0 %v68_v53 }
  0x45   :  { %v132_v55 = vld [vmem:[#allocation5 + $0x240] sm:$0xff]  ;;  %676 = vmatpush.msra.mxu3 %v260_v54 }
  0x46   :  { %v192_v56 = vld [vmem:[#allocation5 + $0x420] sm:$0xff]  ;;  %636 = vmatpush.msra.mxu1 %v132_v55 }
  0x47   :  { %v64_v57 = vld [vmem:[#allocation5 + $0x20] sm:$0xff]  ;;  %657 = vmatpush.msra.mxu2 %v192_v56 }
  0x48   :  { %v256_v58 = vld [vmem:[#allocation5 + $0x620] sm:$0xff]  ;;  %617 = vmatpush.msra.mxu0 %v64_v57 }
  0x49   :  { %v128_v59 = vld [vmem:[#allocation5 + $0x220] sm:$0xff]  ;;  %677 = vmatpush.msra.mxu3 %v256_v58 }
  0x4a   :  { %v188_v60 = vld [vmem:[#allocation5 + $0x400] sm:$0xff]  ;;  %637 = vmatpush.msra.mxu1 %v128_v59 }
  0x4b   :  { %v60_v61 = vld [vmem:[#allocation5] sm:$0xff]  ;;  %658 = vmatpush.msra.mxu2 %v188_v60 }
  0x4c   :  { %v504_v62 = vld [vmem:[#allocation5 + $0xde0] sm:$0xff]  ;;  %618 = vmatpush.msra.mxu0 %v60_v61 }
  0x4d   :  { %v252_v63 = vld [vmem:[#allocation5 + $0x600] sm:$0xff]  ;;  %723 = vmatpush.msrb.mxu2 %v504_v62  ;;  %v1427_v62 = vld.sshfl [vmem:[#allocation1 + $0x10] sm:$0xff pattern:$0x73625140] }
  0x4e   :  { %v376_v0 = vld [vmem:[#allocation5 + $0x9e0] sm:$0xff]  ;;  %678 = vmatpush.msra.mxu3 %v252_v63  ;;  %659 = vmatmul.f32.vlgmr.msra.gmra.mxu2 %v1427_v62 }
  0x4f   :  { %v568_v1 = vld [vmem:[#allocation5 + $0xfe0] sm:$0xff]  ;;  %683 = vmatpush.msrb.mxu0 %v376_v0  ;;  %v249_v0 = vld [vmem:[#allocation5 + $0x5e8] sm:$0xff] }
  0x50   :  { %v500_v2 = vld [vmem:[#allocation5 + $0xdc0] sm:$0xff]  ;;  %743 = vmatpush.msrb.mxu3 %v568_v1 }
  0x51   :  { %v124_v3 = vld [vmem:[#allocation5 + $0x200] sm:$0xff]  ;;  %724 = vmatpush.msrb.mxu2 %v500_v2 }
  0x52   :  { %v372_v4 = vld [vmem:[#allocation5 + $0x9c0] sm:$0xff]  ;;  %638 = vmatpush.msra.mxu1 %v124_v3  ;;  %v1429_v3 = vld.sshfl [vmem:[#allocation1] sm:$0xff pattern:$0x73625140] }
  0x53   :  { %v440_v5 = vld [vmem:[#allocation5 + $0xbe0] sm:$0xff]  ;;  %684 = vmatpush.msrb.mxu0 %v372_v4 }
  0x54   :  { %v496_v6 = vld [vmem:[#allocation5 + $0xda0] sm:$0xff]  ;;  %703 = vmatpush.msrb.mxu1 %v440_v5  ;;  %v121_v5 = vld [vmem:[#allocation5 + $0x1e8] sm:$0xff]  ;;  %619 = vmatmul.f32.vlgmr.msra.gmra.mxu0 %v1429_v3 }
  0x55   :  { %v564_v7 = vld [vmem:[#allocation5 + $0xfc0] sm:$0xff]  ;;  %725 = vmatpush.msrb.mxu2 %v496_v6  ;;  %v245_v6 = vld [vmem:[#allocation5 + $0x5c8] sm:$0xff] }
  0x56   :  { %v368_v8 = vld [vmem:[#allocation5 + $0x9a0] sm:$0xff]  ;;  %744 = vmatpush.msrb.mxu3 %v564_v7  ;;  %v313_v7 = vld [vmem:[#allocation5 + $0x7e8] sm:$0xff] }
  0x57   :  { %v436_v9 = vld [vmem:[#allocation5 + $0xbc0] sm:$0xff]  ;;  %685 = vmatpush.msrb.mxu0 %v368_v8 }
  0x58   :  { %v492_v10 = vld [vmem:[#allocation5 + $0xd80] sm:$0xff]  ;;  %704 = vmatpush.msrb.mxu1 %v436_v9  ;;  %v117_v9 = vld [vmem:[#allocation5 + $0x1c8] sm:$0xff] }
  0x59   :  { %v560_v11 = vld [vmem:[#allocation5 + $0xfa0] sm:$0xff]  ;;  %726 = vmatpush.msrb.mxu2 %v492_v10  ;;  %v1436_v10 = vld.sshfl [vmem:[#allocation1 + $0x8] sm:$0xff pattern:$0x73625140] }
  0x5a   :  { %v364_v12 = vld [vmem:[#allocation5 + $0x980] sm:$0xff]  ;;  %745 = vmatpush.msrb.mxu3 %v560_v11  ;;  %v241_v11 = vld [vmem:[#allocation5 + $0x5a8] sm:$0xff]  ;;  %639 = vmatmul.f32.vlgmr.msra.gmra.mxu1 %v1436_v10 }
  0x5b   :  { %v432_v13 = vld [vmem:[#allocation5 + $0xba0] sm:$0xff]  ;;  %686 = vmatpush.msrb.mxu0 %v364_v12  ;;  %v185_v12 = vld [vmem:[#allocation5 + $0x3e8] sm:$0xff] }
  0x5c   :  { %v488_v14 = vld [vmem:[#allocation5 + $0xd60] sm:$0xff]  ;;  %705 = vmatpush.msrb.mxu1 %v432_v13  ;;  %v309_v13 = vld [vmem:[#allocation5 + $0x7c8] sm:$0xff] }
  0x5d   :  { %v556_v15 = vld [vmem:[#allocation5 + $0xf80] sm:$0xff]  ;;  %727 = vmatpush.msrb.mxu2 %v488_v14  ;;  %v113_v14 = vld [vmem:[#allocation5 + $0x1a8] sm:$0xff] }
  0x5e   :  { %v360_v16 = vld [vmem:[#allocation5 + $0x960] sm:$0xff]  ;;  %746 = vmatpush.msrb.mxu3 %v556_v15  ;;  %v237_v15 = vld [vmem:[#allocation5 + $0x588] sm:$0xff] }
  0x5f   :  { %v428_v17 = vld [vmem:[#allocation5 + $0xb80] sm:$0xff]  ;;  %687 = vmatpush.msrb.mxu0 %v360_v16  ;;  %v181_v16 = vld [vmem:[#allocation5 + $0x3c8] sm:$0xff] }
  0x60   :  { %v484_v18 = vld [vmem:[#allocation5 + $0xd40] sm:$0xff]  ;;  %706 = vmatpush.msrb.mxu1 %v428_v17  ;;  %v305_v17 = vld [vmem:[#allocation5 + $0x7a8] sm:$0xff] }
  0x61   :  { %v552_v19 = vld [vmem:[#allocation5 + $0xf60] sm:$0xff]  ;;  %728 = vmatpush.msrb.mxu2 %v484_v18  ;;  %v1439_v18 = vld.sshfl [vmem:[#allocation1 + $0x30] sm:$0xff pattern:$0x73625140] }
  0x62   :  { %v356_v20 = vld [vmem:[#allocation5 + $0x940] sm:$0xff]  ;;  %747 = vmatpush.msrb.mxu3 %v552_v19  ;;  %v109_v19 = vld [vmem:[#allocation5 + $0x188] sm:$0xff] }
  0x63   :  { %v424_v21 = vld [vmem:[#allocation5 + $0xb60] sm:$0xff]  ;;  %688 = vmatpush.msrb.mxu0 %v356_v20  ;;  %v177_v20 = vld [vmem:[#allocation5 + $0x3a8] sm:$0xff] }
  0x64   :  { %v480_v22 = vld [vmem:[#allocation5 + $0xd20] sm:$0xff]  ;;  %707 = vmatpush.msrb.mxu1 %v424_v21  ;;  %v233_v21 = vld [vmem:[#allocation5 + $0x568] sm:$0xff] }
  0x65   :  { %v548_v23 = vld [vmem:[#allocation5 + $0xf40] sm:$0xff]  ;;  %729 = vmatpush.msrb.mxu2 %v480_v22  ;;  %v301_v22 = vld [vmem:[#allocation5 + $0x788] sm:$0xff] }
  0x66   :  { %v352_v25 = vld [vmem:[#allocation5 + $0x920] sm:$0xff]  ;;  %748 = vmatpush.msrb.mxu3 %v548_v23  ;;  %v1441_v23 = vld.sshfl [vmem:[#allocation1 + $0x20] sm:$0xff pattern:$0x73625140] }
  0x67   :  { %v420_v26 = vld [vmem:[#allocation5 + $0xb40] sm:$0xff]  ;;  %689 = vmatpush.msrb.mxu0 %v352_v25  ;;  %v105_v25 = vld [vmem:[#allocation5 + $0x168] sm:$0xff] }
  0x68   :  { %v476_v27 = vld [vmem:[#allocation5 + $0xd00] sm:$0xff]  ;;  %708 = vmatpush.msrb.mxu1 %v420_v26  ;;  %v173_v26 = vld [vmem:[#allocation5 + $0x388] sm:$0xff] }
  0x69   :  { %v544_v28 = vld [vmem:[#allocation5 + $0xf20] sm:$0xff]  ;;  %730 = vmatpush.msrb.mxu2 %v476_v27  ;;  %v229_v27 = vld [vmem:[#allocation5 + $0x548] sm:$0xff] }
  0x6a   :  { %v348_v29 = vld [vmem:[#allocation5 + $0x900] sm:$0xff]  ;;  %749 = vmatpush.msrb.mxu3 %v544_v28  ;;  %v297_v28 = vld [vmem:[#allocation5 + $0x768] sm:$0xff] }
  0x6b   :  { %v416_v30 = vld [vmem:[#allocation5 + $0xb20] sm:$0xff]  ;;  %690 = vmatpush.msrb.mxu0 %v348_v29  ;;  %v1447_v29 = vld.sshfl [vmem:[#allocation1 + $0x28] sm:$0xff pattern:$0x73625140] }
  0x6c   :  { %v472_v31 = vld [vmem:[#allocation5 + $0xce0] sm:$0xff]  ;;  %709 = vmatpush.msrb.mxu1 %v416_v30  ;;  %v101_v30 = vld [vmem:[#allocation5 + $0x148] sm:$0xff] }
  0x6d   :  { %v540_v32 = vld [vmem:[#allocation5 + $0xf00] sm:$0xff]  ;;  %731 = vmatpush.msrb.mxu2 %v472_v31  ;;  %v169_v31 = vld [vmem:[#allocation5 + $0x368] sm:$0xff] }
  0x6e   :  { %v344_v33 = vld [vmem:[#allocation5 + $0x8e0] sm:$0xff]  ;;  %750 = vmatpush.msrb.mxu3 %v540_v32  ;;  %v225_v32 = vld [vmem:[#allocation5 + $0x528] sm:$0xff] }
  0x6f   :  { %v412_v34 = vld [vmem:[#allocation5 + $0xb00] sm:$0xff]  ;;  %691 = vmatpush.msrb.mxu0 %v344_v33  ;;  %v293_v33 = vld [vmem:[#allocation5 + $0x748] sm:$0xff] }
  0x70   :  { %v468_v35 = vld [vmem:[#allocation5 + $0xcc0] sm:$0xff]  ;;  %710 = vmatpush.msrb.mxu1 %v412_v34  ;;  %v97_v34 = vld [vmem:[#allocation5 + $0x128] sm:$0xff] }
  0x71   :  { %v536_v36 = vld [vmem:[#allocation5 + $0xee0] sm:$0xff]  ;;  %732 = vmatpush.msrb.mxu2 %v468_v35  ;;  %v165_v35 = vld [vmem:[#allocation5 + $0x348] sm:$0xff] }
  0x72   :  { %v340_v38 = vld [vmem:[#allocation5 + $0x8c0] sm:$0xff]  ;;  %751 = vmatpush.msrb.mxu3 %v536_v36  ;;  %v221_v36 = vld [vmem:[#allocation5 + $0x508] sm:$0xff] }
  0x73   :  { %v408_v39 = vld [vmem:[#allocation5 + $0xae0] sm:$0xff]  ;;  %692 = vmatpush.msrb.mxu0 %v340_v38  ;;  %v93_v38 = vld [vmem:[#allocation5 + $0x108] sm:$0xff] }
  0x74   :  { %v464_v40 = vld [vmem:[#allocation5 + $0xca0] sm:$0xff]  ;;  %711 = vmatpush.msrb.mxu1 %v408_v39  ;;  %v161_v39 = vld [vmem:[#allocation5 + $0x328] sm:$0xff] }
  0x75   :  { %v532_v41 = vld [vmem:[#allocation5 + $0xec0] sm:$0xff]  ;;  %733 = vmatpush.msrb.mxu2 %v464_v40  ;;  %v217_v40 = vld [vmem:[#allocation5 + $0x4e8] sm:$0xff] }
  0x76   :  { %v336_v42 = vld [vmem:[#allocation5 + $0x8a0] sm:$0xff]  ;;  %752 = vmatpush.msrb.mxu3 %v532_v41  ;;  %v285_v41 = vld [vmem:[#allocation5 + $0x708] sm:$0xff] }
  0x77   :  { %v404_v43 = vld [vmem:[#allocation5 + $0xac0] sm:$0xff]  ;;  %693 = vmatpush.msrb.mxu0 %v336_v42  ;;  %v89_v42 = vld [vmem:[#allocation5 + $0xe8] sm:$0xff] }
  0x78   :  { %v460_v44 = vld [vmem:[#allocation5 + $0xc80] sm:$0xff]  ;;  %712 = vmatpush.msrb.mxu1 %v404_v43  ;;  %v157_v43 = vld [vmem:[#allocation5 + $0x308] sm:$0xff] }
  0x79   :  { %v528_v45 = vld [vmem:[#allocation5 + $0xea0] sm:$0xff]  ;;  %734 = vmatpush.msrb.mxu2 %v460_v44  ;;  %v213_v44 = vld [vmem:[#allocation5 + $0x4c8] sm:$0xff] }
  0x7a   :  { %v332_v46 = vld [vmem:[#allocation5 + $0x880] sm:$0xff]  ;;  %753 = vmatpush.msrb.mxu3 %v528_v45  ;;  %v281_v45 = vld [vmem:[#allocation5 + $0x6e8] sm:$0xff] }
  0x7b   :  { %v400_v47 = vld [vmem:[#allocation5 + $0xaa0] sm:$0xff]  ;;  %694 = vmatpush.msrb.mxu0 %v332_v46  ;;  %v85_v46 = vld [vmem:[#allocation5 + $0xc8] sm:$0xff] }
  0x7c   :  { %v456_v48 = vld [vmem:[#allocation5 + $0xc60] sm:$0xff]  ;;  %713 = vmatpush.msrb.mxu1 %v400_v47  ;;  %v153_v47 = vld [vmem:[#allocation5 + $0x2e8] sm:$0xff] }
  0x7d   :  { %v524_v49 = vld [vmem:[#allocation5 + $0xe80] sm:$0xff]  ;;  %735 = vmatpush.msrb.mxu2 %v456_v48  ;;  %v209_v48 = vld [vmem:[#allocation5 + $0x4a8] sm:$0xff] }
  0x7e   :  { %v328_v50 = vld [vmem:[#allocation5 + $0x860] sm:$0xff]  ;;  %754 = vmatpush.msrb.mxu3 %v524_v49  ;;  %v277_v49 = vld [vmem:[#allocation5 + $0x6c8] sm:$0xff] }
  0x7f   :  { %v396_v51 = vld [vmem:[#allocation5 + $0xa80] sm:$0xff]  ;;  %695 = vmatpush.msrb.mxu0 %v328_v50  ;;  %v81_v50 = vld [vmem:[#allocation5 + $0xa8] sm:$0xff] }
  0x80   :  { %v452_v52 = vld [vmem:[#allocation5 + $0xc40] sm:$0xff]  ;;  %714 = vmatpush.msrb.mxu1 %v396_v51  ;;  %v149_v51 = vld [vmem:[#allocation5 + $0x2c8] sm:$0xff] }
  0x81   :  { %v520_v53 = vld [vmem:[#allocation5 + $0xe60] sm:$0xff]  ;;  %736 = vmatpush.msrb.mxu2 %v452_v52  ;;  %v205_v52 = vld [vmem:[#allocation5 + $0x488] sm:$0xff] }
  0x82   :  { %v324_v54 = vld [vmem:[#allocation5 + $0x840] sm:$0xff]  ;;  %755 = vmatpush.msrb.mxu3 %v520_v53  ;;  %v273_v53 = vld [vmem:[#allocation5 + $0x6a8] sm:$0xff] }
  0x83   :  { %v392_v55 = vld [vmem:[#allocation5 + $0xa60] sm:$0xff]  ;;  %696 = vmatpush.msrb.mxu0 %v324_v54  ;;  %v77_v54 = vld [vmem:[#allocation5 + $0x88] sm:$0xff] }
  0x84   :  { %v448_v56 = vld [vmem:[#allocation5 + $0xc20] sm:$0xff]  ;;  %715 = vmatpush.msrb.mxu1 %v392_v55  ;;  %v145_v55 = vld [vmem:[#allocation5 + $0x2a8] sm:$0xff] }
  0x85   :  { %v516_v57 = vld [vmem:[#allocation5 + $0xe40] sm:$0xff]  ;;  %737 = vmatpush.msrb.mxu2 %v448_v56  ;;  %v201_v56 = vld [vmem:[#allocation5 + $0x468] sm:$0xff] }
  0x86   :  { %v320_v58 = vld [vmem:[#allocation5 + $0x820] sm:$0xff]  ;;  %756 = vmatpush.msrb.mxu3 %v516_v57  ;;  %v269_v57 = vld [vmem:[#allocation5 + $0x688] sm:$0xff] }
  0x87   :  { %v388_v59 = vld [vmem:[#allocation5 + $0xa40] sm:$0xff]  ;;  %697 = vmatpush.msrb.mxu0 %v320_v58  ;;  %v73_v58 = vld [vmem:[#allocation5 + $0x68] sm:$0xff] }
  0x88   :  { %v444_v60 = vld [vmem:[#allocation5 + $0xc00] sm:$0xff]  ;;  %716 = vmatpush.msrb.mxu1 %v388_v59  ;;  %v141_v59 = vld [vmem:[#allocation5 + $0x288] sm:$0xff] }
  0x89   :  { %v512_v61 = vld [vmem:[#allocation5 + $0xe20] sm:$0xff]  ;;  %738 = vmatpush.msrb.mxu2 %v444_v60  ;;  %v197_v60 = vld [vmem:[#allocation5 + $0x448] sm:$0xff] }
  0x8a   :  { %v316_v63 = vld [vmem:[#allocation5 + $0x800] sm:$0xff]  ;;  %757 = vmatpush.msrb.mxu3 %v512_v61  ;;  %739 = vmatmul.f32.vlgmr.msrb.gmra.mxu2 %v1439_v18  ;;  %v265_v61 = vld [vmem:[#allocation5 + $0x668] sm:$0xff] }
  0x8b   :  { %v384_v1 = vld [vmem:[#allocation5 + $0xa20] sm:$0xff]  ;;  %698 = vmatpush.msrb.mxu0 %v316_v63  ;;  %803 = vmatpush.msra.mxu2 %v249_v0  ;;  %v69_v63 = vld [vmem:[#allocation5 + $0x48] sm:$0xff] }
  0x8c   :  { %v508_v2 = vld [vmem:[#allocation5 + $0xe00] sm:$0xff]  ;;  %717 = vmatpush.msrb.mxu1 %v384_v1  ;;  %699 = vmatmul.f32.vlgmr.msrb.gmra.mxu0 %v1441_v23  ;;  %v137_v0 = vld [vmem:[#allocation5 + $0x268] sm:$0xff] }
  0x8d   :  { %v1432_v4 = vld.sshfl [vmem:[#allocation1 + $0x18] sm:$0xff pattern:$0x73625140]  ;;  %758 = vmatpush.msrb.mxu3 %v508_v2  ;;  %763 = vmatpush.msra.mxu0 %v121_v5  ;;  %v193_v1 = vld [vmem:[#allocation5 + $0x428] sm:$0xff] }
  0x8e   :  { %v380_v8 = vld [vmem:[#allocation5 + $0xa00] sm:$0xff]  ;;  %679 = vmatmul.f32.vlgmr.msra.gmra.mxu3 %v1432_v4  ;;  %804 = vmatpush.msra.mxu2 %v245_v6  ;;  %v261_v2 = vld [vmem:[#allocation5 + $0x648] sm:$0xff] }
  0x8f   :  { %823 = vmatpush.msra.mxu3 %v313_v7  ;;  %718 = vmatpush.msrb.mxu1 %v380_v8  ;;  %v1444_v24 = vld.sshfl [vmem:[#allocation1 + $0x38] sm:$0xff pattern:$0x73625140]  ;;  %v65_v5 = vld [vmem:[#allocation5 + $0x28] sm:$0xff] }
  0x90   :  { %764 = vmatpush.msra.mxu0 %v117_v9  ;;  %805 = vmatpush.msra.mxu2 %v241_v11  ;;  %v133_v6 = vld [vmem:[#allocation5 + $0x248] sm:$0xff] }
  0x91   :  { %783 = vmatpush.msra.mxu1 %v185_v12  ;;  %824 = vmatpush.msra.mxu3 %v309_v13  ;;  %v189_v7 = vld [vmem:[#allocation5 + $0x408] sm:$0xff] }
  0x92   :  { %765 = vmatpush.msra.mxu0 %v113_v14  ;;  %806 = vmatpush.msra.mxu2 %v237_v15  ;;  %v257_v8 = vld [vmem:[#allocation5 + $0x628] sm:$0xff] }
  0x93   :  { %784 = vmatpush.msra.mxu1 %v181_v16  ;;  %825 = vmatpush.msra.mxu3 %v305_v17  ;;  %v505_v9 = vld [vmem:[#allocation5 + $0xde8] sm:$0xff] }
  0x94   :  { %766 = vmatpush.msra.mxu0 %v109_v19  ;;  %807 = vmatpush.msra.mxu2 %v233_v21  ;;  %v61_v11 = vld [vmem:[#allocation5 + $0x8] sm:$0xff] }
  0x95   :  { %785 = vmatpush.msra.mxu1 %v177_v20  ;;  %826 = vmatpush.msra.mxu3 %v301_v22  ;;  %v129_v12 = vld [vmem:[#allocation5 + $0x228] sm:$0xff] }
  0x96   :  { %759 = vmatmul.f32.vlgmr.msrb.gmra.mxu3 %v1444_v24  ;;  %767 = vmatpush.msra.mxu0 %v105_v25  ;;  %v253_v13 = vld [vmem:[#allocation5 + $0x608] sm:$0xff] }
  0x97   :  { %786 = vmatpush.msra.mxu1 %v173_v26  ;;  %808 = vmatpush.msra.mxu2 %v229_v27  ;;  %v377_v14 = vld [vmem:[#allocation5 + $0x9e8] sm:$0xff] }
  0x98   :  { %827 = vmatpush.msra.mxu3 %v297_v28  ;;  %719 = vmatmul.f32.vlgmr.msrb.gmra.mxu1 %v1447_v29  ;;  %v501_v15 = vld [vmem:[#allocation5 + $0xdc8] sm:$0xff] }
  0x99   :  { %768 = vmatpush.msra.mxu0 %v101_v30  ;;  %787 = vmatpush.msra.mxu1 %v169_v31  ;;  %v569_v16 = vld [vmem:[#allocation5 + $0xfe8] sm:$0xff] }
  0x9a   :  { %809 = vmatpush.msra.mxu2 %v225_v32  ;;  %828 = vmatpush.msra.mxu3 %v293_v33  ;;  %v125_v17 = vld [vmem:[#allocation5 + $0x208] sm:$0xff] }
  0x9b   :  { %769 = vmatpush.msra.mxu0 %v97_v34  ;;  %788 = vmatpush.msra.mxu1 %v165_v35  ;;  %v373_v19 = vld [vmem:[#allocation5 + $0x9c8] sm:$0xff] }
  0x9c   :  { %810 = vmatpush.msra.mxu2 %v221_v36  ;;  %829 = vmatpush.msra.mxu3 %v289_v37  ;;  %v441_v20 = vld [vmem:[#allocation5 + $0xbe8] sm:$0xff] }
  0x9d   :  { %770 = vmatpush.msra.mxu0 %v93_v38  ;;  %789 = vmatpush.msra.mxu1 %v161_v39  ;;  %v497_v21 = vld [vmem:[#allocation5 + $0xda8] sm:$0xff] }
  0x9e   :  { %811 = vmatpush.msra.mxu2 %v217_v40  ;;  %830 = vmatpush.msra.mxu3 %v285_v41  ;;  %v565_v22 = vld [vmem:[#allocation5 + $0xfc8] sm:$0xff] }
  0x9f   :  { %771 = vmatpush.msra.mxu0 %v89_v42  ;;  %790 = vmatpush.msra.mxu1 %v157_v43  ;;  %v369_v25 = vld [vmem:[#allocation5 + $0x9a8] sm:$0xff] }
  0xa0   :  { %812 = vmatpush.msra.mxu2 %v213_v44  ;;  %831 = vmatpush.msra.mxu3 %v281_v45  ;;  %v437_v26 = vld [vmem:[#allocation5 + $0xbc8] sm:$0xff] }
  0xa1   :  { %772 = vmatpush.msra.mxu0 %v85_v46  ;;  %791 = vmatpush.msra.mxu1 %v153_v47  ;;  %v493_v27 = vld [vmem:[#allocation5 + $0xd88] sm:$0xff] }
  0xa2   :  { %813 = vmatpush.msra.mxu2 %v209_v48  ;;  %832 = vmatpush.msra.mxu3 %v277_v49  ;;  %v561_v28 = vld [vmem:[#allocation5 + $0xfa8] sm:$0xff] }
  0xa3   :  { %773 = vmatpush.msra.mxu0 %v81_v50  ;;  %792 = vmatpush.msra.mxu1 %v149_v51  ;;  %v365_v30 = vld [vmem:[#allocation5 + $0x988] sm:$0xff] }
  0xa4   :  { %814 = vmatpush.msra.mxu2 %v205_v52  ;;  %833 = vmatpush.msra.mxu3 %v273_v53  ;;  %v433_v31 = vld [vmem:[#allocation5 + $0xba8] sm:$0xff] }
  0xa5   :  { %774 = vmatpush.msra.mxu0 %v77_v54  ;;  %793 = vmatpush.msra.mxu1 %v145_v55  ;;  %v489_v32 = vld [vmem:[#allocation5 + $0xd68] sm:$0xff] }
  0xa6   :  { %815 = vmatpush.msra.mxu2 %v201_v56  ;;  %834 = vmatpush.msra.mxu3 %v269_v57  ;;  %v557_v33 = vld [vmem:[#allocation5 + $0xf88] sm:$0xff] }
  0xa7   :  { %775 = vmatpush.msra.mxu0 %v73_v58  ;;  %794 = vmatpush.msra.mxu1 %v141_v59  ;;  %v361_v34 = vld [vmem:[#allocation5 + $0x968] sm:$0xff] }
  0xa8   :  { %816 = vmatpush.msra.mxu2 %v197_v60  ;;  %835 = vmatpush.msra.mxu3 %v265_v61  ;;  %v429_v35 = vld [vmem:[#allocation5 + $0xb88] sm:$0xff] }
  0xa9   :  { %776 = vmatpush.msra.mxu0 %v69_v63  ;;  %795 = vmatpush.msra.mxu1 %v137_v0  ;;  %v485_v36 = vld [vmem:[#allocation5 + $0xd48] sm:$0xff] }
  0xaa   :  { %817 = vmatpush.msra.mxu2 %v193_v1  ;;  %836 = vmatpush.msra.mxu3 %v261_v2  ;;  %v553_v37 = vld [vmem:[#allocation5 + $0xf68] sm:$0xff] }
  0xab   :  { %777 = vmatpush.msra.mxu0 %v65_v5  ;;  %796 = vmatpush.msra.mxu1 %v133_v6  ;;  %v357_v38 = vld [vmem:[#allocation5 + $0x948] sm:$0xff] }
  0xac   :  { %818 = vmatpush.msra.mxu2 %v189_v7  ;;  %837 = vmatpush.msra.mxu3 %v257_v8  ;;  %v425_v39 = vld [vmem:[#allocation5 + $0xb68] sm:$0xff] }
  0xad   :  { %778 = vmatpush.msra.mxu0 %v61_v11  ;;  %797 = vmatpush.msra.mxu1 %v129_v12  ;;  %v481_v40 = vld [vmem:[#allocation5 + $0xd28] sm:$0xff] }
  0xae   :  { %883 = vmatpush.msrb.mxu2 %v505_v9  ;;  %838 = vmatpush.msra.mxu3 %v253_v13  ;;  %v549_v41 = vld [vmem:[#allocation5 + $0xf48] sm:$0xff] }
  0xaf   :  { %843 = vmatpush.msrb.mxu0 %v377_v14  ;;  %798 = vmatpush.msra.mxu1 %v125_v17  ;;  %v353_v42 = vld [vmem:[#allocation5 + $0x928] sm:$0xff] }
  0xb0   :  { %884 = vmatpush.msrb.mxu2 %v501_v15  ;;  %903 = vmatpush.msrb.mxu3 %v569_v16  ;;  %v421_v43 = vld [vmem:[#allocation5 + $0xb48] sm:$0xff] }
  0xb1   :  { %844 = vmatpush.msrb.mxu0 %v373_v19  ;;  %863 = vmatpush.msrb.mxu1 %v441_v20  ;;  %v477_v44 = vld [vmem:[#allocation5 + $0xd08] sm:$0xff]  ;;  %v246_v20 = vld [vmem:[#allocation5 + $0x5d0] sm:$0xff] }
  0xb2   :  { %885 = vmatpush.msrb.mxu2 %v497_v21  ;;  %904 = vmatpush.msrb.mxu3 %v565_v22  ;;  %v545_v45 = vld [vmem:[#allocation5 + $0xf28] sm:$0xff]  ;;  %v314_v21 = vld [vmem:[#allocation5 + $0x7f0] sm:$0xff] }
  0xb3   :  { %845 = vmatpush.msrb.mxu0 %v369_v25  ;;  %864 = vmatpush.msrb.mxu1 %v437_v26  ;;  %v349_v46 = vld [vmem:[#allocation5 + $0x908] sm:$0xff]  ;;  %v118_v25 = vld [vmem:[#allocation5 + $0x1d0] sm:$0xff] }
  0xb4   :  { %886 = vmatpush.msrb.mxu2 %v493_v27  ;;  %905 = vmatpush.msrb.mxu3 %v561_v28  ;;  %v417_v47 = vld [vmem:[#allocation5 + $0xb28] sm:$0xff]  ;;  %v242_v26 = vld [vmem:[#allocation5 + $0x5b0] sm:$0xff] }
  0xb5   :  { %846 = vmatpush.msrb.mxu0 %v365_v30  ;;  %865 = vmatpush.msrb.mxu1 %v433_v31  ;;  %v473_v48 = vld [vmem:[#allocation5 + $0xce8] sm:$0xff]  ;;  %v186_v27 = vld [vmem:[#allocation5 + $0x3f0] sm:$0xff] }
  0xb6   :  { %887 = vmatpush.msrb.mxu2 %v489_v32  ;;  %906 = vmatpush.msrb.mxu3 %v557_v33  ;;  %v541_v49 = vld [vmem:[#allocation5 + $0xf08] sm:$0xff]  ;;  %v310_v28 = vld [vmem:[#allocation5 + $0x7d0] sm:$0xff] }
  0xb7   :  { %847 = vmatpush.msrb.mxu0 %v361_v34  ;;  %866 = vmatpush.msrb.mxu1 %v429_v35  ;;  %v345_v50 = vld [vmem:[#allocation5 + $0x8e8] sm:$0xff]  ;;  %v238_v30 = vld [vmem:[#allocation5 + $0x590] sm:$0xff] }
  0xb8   :  { %888 = vmatpush.msrb.mxu2 %v485_v36  ;;  %907 = vmatpush.msrb.mxu3 %v553_v37  ;;  %v413_v51 = vld [vmem:[#allocation5 + $0xb08] sm:$0xff]  ;;  %v182_v31 = vld [vmem:[#allocation5 + $0x3d0] sm:$0xff] }
  0xb9   :  { %848 = vmatpush.msrb.mxu0 %v357_v38  ;;  %867 = vmatpush.msrb.mxu1 %v425_v39  ;;  %v469_v52 = vld [vmem:[#allocation5 + $0xcc8] sm:$0xff]  ;;  %v306_v32 = vld [vmem:[#allocation5 + $0x7b0] sm:$0xff] }
  0xba   :  { %889 = vmatpush.msrb.mxu2 %v481_v40  ;;  %908 = vmatpush.msrb.mxu3 %v549_v41  ;;  %v537_v53 = vld [vmem:[#allocation5 + $0xee8] sm:$0xff]  ;;  %v234_v33 = vld [vmem:[#allocation5 + $0x570] sm:$0xff] }
  0xbb   :  { %849 = vmatpush.msrb.mxu0 %v353_v42  ;;  %868 = vmatpush.msrb.mxu1 %v421_v43  ;;  %v341_v54 = vld [vmem:[#allocation5 + $0x8c8] sm:$0xff]  ;;  %v302_v34 = vld [vmem:[#allocation5 + $0x790] sm:$0xff] }
  0xbc   :  { %890 = vmatpush.msrb.mxu2 %v477_v44  ;;  %909 = vmatpush.msrb.mxu3 %v545_v45  ;;  %v409_v55 = vld [vmem:[#allocation5 + $0xae8] sm:$0xff]  ;;  %v106_v35 = vld [vmem:[#allocation5 + $0x170] sm:$0xff] }
  0xbd   :  { %850 = vmatpush.msrb.mxu0 %v349_v46  ;;  %869 = vmatpush.msrb.mxu1 %v417_v47  ;;  %v465_v56 = vld [vmem:[#allocation5 + $0xca8] sm:$0xff]  ;;  %v230_v36 = vld [vmem:[#allocation5 + $0x550] sm:$0xff] }
  0xbe   :  { %891 = vmatpush.msrb.mxu2 %v473_v48  ;;  %910 = vmatpush.msrb.mxu3 %v541_v49  ;;  %v533_v57 = vld [vmem:[#allocation5 + $0xec8] sm:$0xff]  ;;  %v174_v37 = vld [vmem:[#allocation5 + $0x390] sm:$0xff] }
  0xbf   :  { %851 = vmatpush.msrb.mxu0 %v345_v50  ;;  %870 = vmatpush.msrb.mxu1 %v413_v51  ;;  %v337_v58 = vld [vmem:[#allocation5 + $0x8a8] sm:$0xff]  ;;  %v298_v38 = vld [vmem:[#allocation5 + $0x770] sm:$0xff] }
  0xc0   :  { %892 = vmatpush.msrb.mxu2 %v469_v52  ;;  %911 = vmatpush.msrb.mxu3 %v537_v53  ;;  %v405_v59 = vld [vmem:[#allocation5 + $0xac8] sm:$0xff]  ;;  %v226_v39 = vld [vmem:[#allocation5 + $0x530] sm:$0xff] }
  0xc1   :  { %852 = vmatpush.msrb.mxu0 %v341_v54  ;;  %871 = vmatpush.msrb.mxu1 %v409_v55  ;;  %v461_v60 = vld [vmem:[#allocation5 + $0xc88] sm:$0xff]  ;;  %v170_v40 = vld [vmem:[#allocation5 + $0x370] sm:$0xff] }
  0xc2   :  { %v529_v61 = vld [vmem:[#allocation5 + $0xea8] sm:$0xff]  ;;  %893 = vmatpush.msrb.mxu2 %v465_v56  ;;  %912 = vmatpush.msrb.mxu3 %v533_v57  ;;  %v294_v41 = vld [vmem:[#allocation5 + $0x750] sm:$0xff] }
  0xc3   :  { %v333_v63 = vld [vmem:[#allocation5 + $0x888] sm:$0xff]  ;;  %853 = vmatpush.msrb.mxu0 %v337_v58  ;;  %872 = vmatpush.msrb.mxu1 %v405_v59  ;;  %v98_v42 = vld [vmem:[#allocation5 + $0x130] sm:$0xff] }
  0xc4   :  { %v401_v0 = vld [vmem:[#allocation5 + $0xaa8] sm:$0xff]  ;;  %894 = vmatpush.msrb.mxu2 %v461_v60  ;;  %913 = vmatpush.msrb.mxu3 %v529_v61  ;;  %v222_v43 = vld [vmem:[#allocation5 + $0x510] sm:$0xff] }
  0xc5   :  { %v457_v1 = vld [vmem:[#allocation5 + $0xc68] sm:$0xff]  ;;  %819 = vmatmul.f32.vlgmr.msra.gmra.mxu2 %v1427_v62  ;;  %854 = vmatpush.msrb.mxu0 %v333_v63  ;;  %v166_v44 = vld [vmem:[#allocation5 + $0x350] sm:$0xff] }
  0xc6   :  { %v525_v2 = vld [vmem:[#allocation5 + $0xe88] sm:$0xff]  ;;  %873 = vmatpush.msrb.mxu1 %v401_v0  ;;  %895 = vmatpush.msrb.mxu2 %v457_v1  ;;  %v290_v45 = vld [vmem:[#allocation5 + $0x730] sm:$0xff] }
  0xc7   :  { %v329_v5 = vld [vmem:[#allocation5 + $0x868] sm:$0xff]  ;;  %914 = vmatpush.msrb.mxu3 %v525_v2  ;;  %779 = vmatmul.f32.vlgmr.msra.gmra.mxu0 %v1429_v3  ;;  %v94_v46 = vld [vmem:[#allocation5 + $0x110] sm:$0xff] }
  0xc8   :  { %v397_v6 = vld [vmem:[#allocation5 + $0xa88] sm:$0xff]  ;;  %839 = vmatmul.f32.vlgmr.msra.gmra.mxu3 %v1432_v4  ;;  %855 = vmatpush.msrb.mxu0 %v329_v5  ;;  %v250_v4 = vld [vmem:[#allocation5 + $0x5f0] sm:$0xff] }
  0xc9   :  { %v453_v7 = vld [vmem:[#allocation5 + $0xc48] sm:$0xff]  ;;  %874 = vmatpush.msrb.mxu1 %v397_v6  ;;  %v218_v47 = vld [vmem:[#allocation5 + $0x4f0] sm:$0xff] }
  0xca   :  { %v521_v8 = vld [vmem:[#allocation5 + $0xe68] sm:$0xff]  ;;  %896 = vmatpush.msrb.mxu2 %v453_v7  ;;  %799 = vmatmul.f32.vlgmr.msra.gmra.mxu1 %v1436_v10  ;;  %v122_v10 = vld [vmem:[#allocation5 + $0x1f0] sm:$0xff] }
  0xcb   :  { %v325_v9 = vld [vmem:[#allocation5 + $0x848] sm:$0xff]  ;;  %915 = vmatpush.msrb.mxu3 %v521_v8  ;;  %v162_v48 = vld [vmem:[#allocation5 + $0x330] sm:$0xff] }
  0xcc   :  { %v393_v11 = vld [vmem:[#allocation5 + $0xa68] sm:$0xff]  ;;  %856 = vmatpush.msrb.mxu0 %v325_v9  ;;  %v286_v49 = vld [vmem:[#allocation5 + $0x710] sm:$0xff] }
  0xcd   :  { %v449_v12 = vld [vmem:[#allocation5 + $0xc28] sm:$0xff]  ;;  %875 = vmatpush.msrb.mxu1 %v393_v11  ;;  %v90_v50 = vld [vmem:[#allocation5 + $0xf0] sm:$0xff] }
  0xce   :  { %v517_v13 = vld [vmem:[#allocation5 + $0xe48] sm:$0xff]  ;;  %897 = vmatpush.msrb.mxu2 %v449_v12  ;;  %v214_v51 = vld [vmem:[#allocation5 + $0x4d0] sm:$0xff] }
  0xcf   :  { %v321_v62 = vld [vmem:[#allocation5 + $0x828] sm:$0xff]  ;;  %916 = vmatpush.msrb.mxu3 %v517_v13  ;;  %v158_v52 = vld [vmem:[#allocation5 + $0x310] sm:$0xff] }
  0xd0   :  { %v389_v14 = vld [vmem:[#allocation5 + $0xa48] sm:$0xff]  ;;  %857 = vmatpush.msrb.mxu0 %v321_v62  ;;  %v282_v53 = vld [vmem:[#allocation5 + $0x6f0] sm:$0xff] }
  0xd1   :  { %v445_v15 = vld [vmem:[#allocation5 + $0xc08] sm:$0xff]  ;;  %876 = vmatpush.msrb.mxu1 %v389_v14  ;;  %v86_v54 = vld [vmem:[#allocation5 + $0xd0] sm:$0xff] }
  0xd2   :  { %v513_v16 = vld [vmem:[#allocation5 + $0xe28] sm:$0xff]  ;;  %898 = vmatpush.msrb.mxu2 %v445_v15  ;;  %v210_v55 = vld [vmem:[#allocation5 + $0x4b0] sm:$0xff] }
  0xd3   :  { %v317_v3 = vld [vmem:[#allocation5 + $0x808] sm:$0xff]  ;;  %917 = vmatpush.msrb.mxu3 %v513_v16  ;;  %899 = vmatmul.f32.vlgmr.msrb.gmra.mxu2 %v1439_v18  ;;  %v114_v18 = vld [vmem:[#allocation5 + $0x1b0] sm:$0xff] }
  0xd4   :  { %v385_v17 = vld [vmem:[#allocation5 + $0xa28] sm:$0xff]  ;;  %858 = vmatpush.msrb.mxu0 %v317_v3  ;;  %963 = vmatpush.msra.mxu2 %v250_v4  ;;  %v154_v56 = vld [vmem:[#allocation5 + $0x2f0] sm:$0xff] }
  0xd5   :  { %v509_v19 = vld [vmem:[#allocation5 + $0xe08] sm:$0xff]  ;;  %877 = vmatpush.msrb.mxu1 %v385_v17  ;;  %859 = vmatmul.f32.vlgmr.msrb.gmra.mxu0 %v1441_v23  ;;  %v110_v23 = vld [vmem:[#allocation5 + $0x190] sm:$0xff] }
  0xd6   :  { %918 = vmatpush.msrb.mxu3 %v509_v19  ;;  %v381_v22 = vld [vmem:[#allocation5 + $0xa08] sm:$0xff]  ;;  %923 = vmatpush.msra.mxu0 %v122_v10  ;;  %v278_v57 = vld [vmem:[#allocation5 + $0x6d0] sm:$0xff] }
  0xd7   :  { %919 = vmatmul.f32.vlgmr.msrb.gmra.mxu3 %v1444_v24  ;;  %964 = vmatpush.msra.mxu2 %v246_v20  ;;  %v178_v24 = vld [vmem:[#allocation5 + $0x3b0] sm:$0xff] }
  0xd8   :  { %983 = vmatpush.msra.mxu3 %v314_v21  ;;  %878 = vmatpush.msrb.mxu1 %v381_v22  ;;  %v82_v58 = vld [vmem:[#allocation5 + $0xb0] sm:$0xff] }
  0xd9   :  { %924 = vmatpush.msra.mxu0 %v118_v25  ;;  %879 = vmatmul.f32.vlgmr.msrb.gmra.mxu1 %v1447_v29  ;;  %v102_v29 = vld [vmem:[#allocation5 + $0x150] sm:$0xff] }
  0xda   :  { %965 = vmatpush.msra.mxu2 %v242_v26  ;;  %943 = vmatpush.msra.mxu1 %v186_v27  ;;  %v206_v59 = vld [vmem:[#allocation5 + $0x490] sm:$0xff] }
  0xdb   :  { %984 = vmatpush.msra.mxu3 %v310_v28  ;;  %925 = vmatpush.msra.mxu0 %v114_v18  ;;  %v150_v60 = vld [vmem:[#allocation5 + $0x2d0] sm:$0xff] }
  0xdc   :  { %966 = vmatpush.msra.mxu2 %v238_v30  ;;  %944 = vmatpush.msra.mxu1 %v182_v31  ;;  %v274_v61 = vld [vmem:[#allocation5 + $0x6b0] sm:$0xff] }
  0xdd   :  { %985 = vmatpush.msra.mxu3 %v306_v32  ;;  %926 = vmatpush.msra.mxu0 %v110_v23  ;;  %v78_v63 = vld [vmem:[#allocation5 + $0x90] sm:$0xff] }
  0xde   :  { %967 = vmatpush.msra.mxu2 %v234_v33  ;;  %945 = vmatpush.msra.mxu1 %v178_v24  ;;  %v202_v0 = vld [vmem:[#allocation5 + $0x470] sm:$0xff] }
  0xdf   :  { %986 = vmatpush.msra.mxu3 %v302_v34  ;;  %927 = vmatpush.msra.mxu0 %v106_v35  ;;  %v146_v1 = vld [vmem:[#allocation5 + $0x2b0] sm:$0xff] }
  0xe0   :  { %968 = vmatpush.msra.mxu2 %v230_v36  ;;  %946 = vmatpush.msra.mxu1 %v174_v37  ;;  %v270_v2 = vld [vmem:[#allocation5 + $0x690] sm:$0xff] }
  0xe1   :  { %987 = vmatpush.msra.mxu3 %v298_v38  ;;  %928 = vmatpush.msra.mxu0 %v102_v29  ;;  %v74_v5 = vld [vmem:[#allocation5 + $0x70] sm:$0xff] }
  0xe2   :  { %969 = vmatpush.msra.mxu2 %v226_v39  ;;  %947 = vmatpush.msra.mxu1 %v170_v40  ;;  %v198_v6 = vld [vmem:[#allocation5 + $0x450] sm:$0xff] }
  0xe3   :  { %988 = vmatpush.msra.mxu3 %v294_v41  ;;  %929 = vmatpush.msra.mxu0 %v98_v42  ;;  %v142_v7 = vld [vmem:[#allocation5 + $0x290] sm:$0xff] }
  0xe4   :  { %970 = vmatpush.msra.mxu2 %v222_v43  ;;  %948 = vmatpush.msra.mxu1 %v166_v44  ;;  %v266_v8 = vld [vmem:[#allocation5 + $0x670] sm:$0xff] }
  0xe5   :  { %989 = vmatpush.msra.mxu3 %v290_v45  ;;  %930 = vmatpush.msra.mxu0 %v94_v46  ;;  %v70_v9 = vld [vmem:[#allocation5 + $0x50] sm:$0xff] }
  0xe6   :  { %971 = vmatpush.msra.mxu2 %v218_v47  ;;  %949 = vmatpush.msra.mxu1 %v162_v48  ;;  %v194_v11 = vld [vmem:[#allocation5 + $0x430] sm:$0xff] }
  0xe7   :  { %990 = vmatpush.msra.mxu3 %v286_v49  ;;  %931 = vmatpush.msra.mxu0 %v90_v50  ;;  %v138_v12 = vld [vmem:[#allocation5 + $0x270] sm:$0xff] }
  0xe8   :  { %972 = vmatpush.msra.mxu2 %v214_v51  ;;  %950 = vmatpush.msra.mxu1 %v158_v52  ;;  %v262_v13 = vld [vmem:[#allocation5 + $0x650] sm:$0xff] }
  0xe9   :  { %991 = vmatpush.msra.mxu3 %v282_v53  ;;  %932 = vmatpush.msra.mxu0 %v86_v54  ;;  %v66_v62 = vld [vmem:[#allocation5 + $0x30] sm:$0xff] }
  0xea   :  { %973 = vmatpush.msra.mxu2 %v210_v55  ;;  %951 = vmatpush.msra.mxu1 %v154_v56  ;;  %v190_v14 = vld [vmem:[#allocation5 + $0x410] sm:$0xff] }
  0xeb   :  { %992 = vmatpush.msra.mxu3 %v278_v57  ;;  %933 = vmatpush.msra.mxu0 %v82_v58  ;;  %v134_v15 = vld [vmem:[#allocation5 + $0x250] sm:$0xff] }
  0xec   :  { %974 = vmatpush.msra.mxu2 %v206_v59  ;;  %952 = vmatpush.msra.mxu1 %v150_v60  ;;  %v258_v16 = vld [vmem:[#allocation5 + $0x630] sm:$0xff] }
  0xed   :  { %993 = vmatpush.msra.mxu3 %v274_v61  ;;  %934 = vmatpush.msra.mxu0 %v78_v63  ;;  %v506_v3 = vld [vmem:[#allocation5 + $0xdf0] sm:$0xff] }
  0xee   :  { %975 = vmatpush.msra.mxu2 %v202_v0  ;;  %953 = vmatpush.msra.mxu1 %v146_v1  ;;  %v62_v4 = vld [vmem:[#allocation5 + $0x10] sm:$0xff] }
  0xef   :  { %994 = vmatpush.msra.mxu3 %v270_v2  ;;  %935 = vmatpush.msra.mxu0 %v74_v5  ;;  %v130_v17 = vld [vmem:[#allocation5 + $0x230] sm:$0xff] }
  0xf0   :  { %976 = vmatpush.msra.mxu2 %v198_v6  ;;  %954 = vmatpush.msra.mxu1 %v142_v7  ;;  %v254_v19 = vld [vmem:[#allocation5 + $0x610] sm:$0xff] }
  0xf1   :  { %995 = vmatpush.msra.mxu3 %v266_v8  ;;  %936 = vmatpush.msra.mxu0 %v70_v9  ;;  %v378_v10 = vld [vmem:[#allocation5 + $0x9f0] sm:$0xff] }
  0xf2   :  { %977 = vmatpush.msra.mxu2 %v194_v11  ;;  %955 = vmatpush.msra.mxu1 %v138_v12  ;;  %v502_v20 = vld [vmem:[#allocation5 + $0xdd0] sm:$0xff] }
  0xf3   :  { %996 = vmatpush.msra.mxu3 %v262_v13  ;;  %937 = vmatpush.msra.mxu0 %v66_v62  ;;  %v570_v21 = vld [vmem:[#allocation5 + $0xff0] sm:$0xff] }
  0xf4   :  { %978 = vmatpush.msra.mxu2 %v190_v14  ;;  %956 = vmatpush.msra.mxu1 %v134_v15  ;;  %v126_v22 = vld [vmem:[#allocation5 + $0x210] sm:$0xff] }
  0xf5   :  { %997 = vmatpush.msra.mxu3 %v258_v16  ;;  %938 = vmatpush.msra.mxu0 %v62_v4  ;;  %v374_v25 = vld [vmem:[#allocation5 + $0x9d0] sm:$0xff]  ;;  %v251_v4 = vld [vmem:[#allocation5 + $0x5f8] sm:$0xff] }
  0xf6   :  { %1043 = vmatpush.msrb.mxu2 %v506_v3  ;;  %957 = vmatpush.msra.mxu1 %v130_v17  ;;  %v442_v26 = vld [vmem:[#allocation5 + $0xbf0] sm:$0xff] }
  0xf7   :  { %998 = vmatpush.msra.mxu3 %v254_v19  ;;  %1003 = vmatpush.msrb.mxu0 %v378_v10  ;;  %v498_v27 = vld [vmem:[#allocation5 + $0xdb0] sm:$0xff]  ;;  %v1459_v10 = vld.sshfl [vmem:[#allocation1 + $0x10] sm:$0xff pattern:$0x73625140] }
  0xf8   :  { %1044 = vmatpush.msrb.mxu2 %v502_v20  ;;  %v566_v28 = vld [vmem:[#allocation5 + $0xfd0] sm:$0xff]  ;;  %958 = vmatpush.msra.mxu1 %v126_v22  ;;  %v123_v20 = vld [vmem:[#allocation5 + $0x1f8] sm:$0xff] }
  0xf9   :  { %1063 = vmatpush.msrb.mxu3 %v570_v21  ;;  %v370_v18 = vld [vmem:[#allocation5 + $0x9b0] sm:$0xff]  ;;  %1004 = vmatpush.msrb.mxu0 %v374_v25  ;;  %v247_v21 = vld [vmem:[#allocation5 + $0x5d8] sm:$0xff]  ;;  %v1462_v25 = vld.sshfl [vmem:[#allocation1] sm:$0xff pattern:$0x73625140] }
  0xfa   :  { %v438_v30 = vld [vmem:[#allocation5 + $0xbd0] sm:$0xff]  ;;  %1023 = vmatpush.msrb.mxu1 %v442_v26  ;;  %1045 = vmatpush.msrb.mxu2 %v498_v27  ;;  %v315_v22 = vld [vmem:[#allocation5 + $0x7f8] sm:$0xff] }
  0xfb   :  { %v494_v31 = vld [vmem:[#allocation5 + $0xd90] sm:$0xff]  ;;  %1064 = vmatpush.msrb.mxu3 %v566_v28  ;;  %1005 = vmatpush.msrb.mxu0 %v370_v18  ;;  %v119_v27 = vld [vmem:[#allocation5 + $0x1d8] sm:$0xff]  ;;  %v1465_v28 = vld.sshfl [vmem:[#allocation1 + $0x18] sm:$0xff pattern:$0x73625140] }
  0xfc   :  { %v562_v32 = vld [vmem:[#allocation5 + $0xfb0] sm:$0xff]  ;;  %1024 = vmatpush.msrb.mxu1 %v438_v30  ;;  %1046 = vmatpush.msrb.mxu2 %v494_v31  ;;  %v243_v18 = vld [vmem:[#allocation5 + $0x5b8] sm:$0xff] }
  0xfd   :  { %v366_v23 = vld [vmem:[#allocation5 + $0x990] sm:$0xff]  ;;  %1065 = vmatpush.msrb.mxu3 %v562_v32  ;;  %979 = vmatmul.f32.vlgmr.msra.gmra.mxu2 %v1459_v10  ;;  %v187_v30 = vld [vmem:[#allocation5 + $0x3f8] sm:$0xff] }
  0xfe   :  { %v434_v33 = vld [vmem:[#allocation5 + $0xbb0] sm:$0xff]  ;;  %1006 = vmatpush.msrb.mxu0 %v366_v23  ;;  %999 = vmatmul.f32.vlgmr.msra.gmra.mxu3 %v1465_v28  ;;  %v311_v31 = vld [vmem:[#allocation5 + $0x7d8] sm:$0xff] }
  0xff   :  { %v490_v24 = vld [vmem:[#allocation5 + $0xd70] sm:$0xff]  ;;  %1025 = vmatpush.msrb.mxu1 %v434_v33  ;;  %939 = vmatmul.f32.vlgmr.msra.gmra.mxu0 %v1462_v25  ;;  %v115_v32 = vld [vmem:[#allocation5 + $0x1b8] sm:$0xff] }
 0x100   :  { %v558_v34 = vld [vmem:[#allocation5 + $0xf90] sm:$0xff]  ;;  %1047 = vmatpush.msrb.mxu2 %v490_v24  ;;  %v239_v23 = vld [vmem:[#allocation5 + $0x598] sm:$0xff] }
 0x101   :  { %v362_v35 = vld [vmem:[#allocation5 + $0x970] sm:$0xff]  ;;  %1066 = vmatpush.msrb.mxu3 %v558_v34  ;;  %v183_v24 = vld [vmem:[#allocation5 + $0x3d8] sm:$0xff] }
 0x102   :  { %v430_v36 = vld [vmem:[#allocation5 + $0xb90] sm:$0xff]  ;;  %1007 = vmatpush.msrb.mxu0 %v362_v35  ;;  %v307_v34 = vld [vmem:[#allocation5 + $0x7b8] sm:$0xff] }
 0x103   :  { %v486_v37 = vld [vmem:[#allocation5 + $0xd50] sm:$0xff]  ;;  %1026 = vmatpush.msrb.mxu1 %v430_v36  ;;  %v111_v35 = vld [vmem:[#allocation5 + $0x198] sm:$0xff] }
 0x104   :  { %v554_v38 = vld [vmem:[#allocation5 + $0xf70] sm:$0xff]  ;;  %1048 = vmatpush.msrb.mxu2 %v486_v37  ;;  %v179_v36 = vld [vmem:[#allocation5 + $0x3b8] sm:$0xff] }
 0x105   :  { %v358_v29 = vld [vmem:[#allocation5 + $0x950] sm:$0xff]  ;;  %1067 = vmatpush.msrb.mxu3 %v554_v38  ;;  %v235_v37 = vld [vmem:[#allocation5 + $0x578] sm:$0xff] }
 0x106   :  { %v426_v39 = vld [vmem:[#allocation5 + $0xb70] sm:$0xff]  ;;  %1008 = vmatpush.msrb.mxu0 %v358_v29  ;;  %v303_v38 = vld [vmem:[#allocation5 + $0x798] sm:$0xff] }
 0x107   :  { %v482_v40 = vld [vmem:[#allocation5 + $0xd30] sm:$0xff]  ;;  %1027 = vmatpush.msrb.mxu1 %v426_v39  ;;  %v1471_v29 = vld.sshfl [vmem:[#allocation1 + $0x30] sm:$0xff pattern:$0x73625140] }
 0x108   :  { %v550_v41 = vld [vmem:[#allocation5 + $0xf50] sm:$0xff]  ;;  %1049 = vmatpush.msrb.mxu2 %v482_v40  ;;  %v107_v39 = vld [vmem:[#allocation5 + $0x178] sm:$0xff] }
 0x109   :  { %v354_v42 = vld [vmem:[#allocation5 + $0x930] sm:$0xff]  ;;  %1068 = vmatpush.msrb.mxu3 %v550_v41  ;;  %v175_v40 = vld [vmem:[#allocation5 + $0x398] sm:$0xff] }
 0x10a   :  { %v422_v43 = vld [vmem:[#allocation5 + $0xb50] sm:$0xff]  ;;  %1009 = vmatpush.msrb.mxu0 %v354_v42  ;;  %v231_v41 = vld [vmem:[#allocation5 + $0x558] sm:$0xff]  ;;  %v1474_v42 = vld.sshfl [vmem:[#allocation1 + $0x20] sm:$0xff pattern:$0x73625140] }
 0x10b   :  { %v478_v44 = vld [vmem:[#allocation5 + $0xd10] sm:$0xff]  ;;  %1028 = vmatpush.msrb.mxu1 %v422_v43  ;;  %v299_v43 = vld [vmem:[#allocation5 + $0x778] sm:$0xff] }
 0x10c   :  { %v546_v45 = vld [vmem:[#allocation5 + $0xf30] sm:$0xff]  ;;  %1050 = vmatpush.msrb.mxu2 %v478_v44  ;;  %v1477_v44 = vld.sshfl [vmem:[#allocation1 + $0x38] sm:$0xff pattern:$0x73625140] }
 0x10d   :  { %v350_v46 = vld [vmem:[#allocation5 + $0x910] sm:$0xff]  ;;  %1069 = vmatpush.msrb.mxu3 %v546_v45  ;;  %v103_v45 = vld [vmem:[#allocation5 + $0x158] sm:$0xff] }
 0x10e   :  { %v418_v47 = vld [vmem:[#allocation5 + $0xb30] sm:$0xff]  ;;  %1010 = vmatpush.msrb.mxu0 %v350_v46  ;;  %v171_v46 = vld [vmem:[#allocation5 + $0x378] sm:$0xff] }
 0x10f   :  { %v474_v48 = vld [vmem:[#allocation5 + $0xcf0] sm:$0xff]  ;;  %1029 = vmatpush.msrb.mxu1 %v418_v47  ;;  %v227_v47 = vld [vmem:[#allocation5 + $0x538] sm:$0xff] }
 0x110   :  { %v542_v49 = vld [vmem:[#allocation5 + $0xf10] sm:$0xff]  ;;  %1051 = vmatpush.msrb.mxu2 %v474_v48  ;;  %v295_v48 = vld [vmem:[#allocation5 + $0x758] sm:$0xff] }
 0x111   :  { %v346_v50 = vld [vmem:[#allocation5 + $0x8f0] sm:$0xff]  ;;  %1070 = vmatpush.msrb.mxu3 %v542_v49 }
 0x112   :  { %v414_v51 = vld [vmem:[#allocation5 + $0xb10] sm:$0xff]  ;;  %1011 = vmatpush.msrb.mxu0 %v346_v50  ;;  %v99_v50 = vld [vmem:[#allocation5 + $0x138] sm:$0xff] }
 0x113   :  { %v470_v52 = vld [vmem:[#allocation5 + $0xcd0] sm:$0xff]  ;;  %1030 = vmatpush.msrb.mxu1 %v414_v51  ;;  %v167_v51 = vld [vmem:[#allocation5 + $0x358] sm:$0xff] }
 0x114   :  { %v538_v53 = vld [vmem:[#allocation5 + $0xef0] sm:$0xff]  ;;  %1052 = vmatpush.msrb.mxu2 %v470_v52  ;;  %v223_v52 = vld [vmem:[#allocation5 + $0x518] sm:$0xff] }
 0x115   :  { %v342_v54 = vld [vmem:[#allocation5 + $0x8d0] sm:$0xff]  ;;  %1071 = vmatpush.msrb.mxu3 %v538_v53  ;;  %v291_v53 = vld [vmem:[#allocation5 + $0x738] sm:$0xff] }
 0x116   :  { %v410_v55 = vld [vmem:[#allocation5 + $0xaf0] sm:$0xff]  ;;  %1012 = vmatpush.msrb.mxu0 %v342_v54  ;;  %v95_v54 = vld [vmem:[#allocation5 + $0x118] sm:$0xff] }
 0x117   :  { %v466_v56 = vld [vmem:[#allocation5 + $0xcb0] sm:$0xff]  ;;  %1031 = vmatpush.msrb.mxu1 %v410_v55  ;;  %v163_v55 = vld [vmem:[#allocation5 + $0x338] sm:$0xff] }
 0x118   :  { %v534_v57 = vld [vmem:[#allocation5 + $0xed0] sm:$0xff]  ;;  %1053 = vmatpush.msrb.mxu2 %v466_v56  ;;  %v219_v56 = vld [vmem:[#allocation5 + $0x4f8] sm:$0xff] }
 0x119   :  { %v338_v58 = vld [vmem:[#allocation5 + $0x8b0] sm:$0xff]  ;;  %1072 = vmatpush.msrb.mxu3 %v534_v57  ;;  %v287_v57 = vld [vmem:[#allocation5 + $0x718] sm:$0xff] }
 0x11a   :  { %v406_v59 = vld [vmem:[#allocation5 + $0xad0] sm:$0xff]  ;;  %1013 = vmatpush.msrb.mxu0 %v338_v58  ;;  %v91_v58 = vld [vmem:[#allocation5 + $0xf8] sm:$0xff] }
 0x11b   :  { %v462_v60 = vld [vmem:[#allocation5 + $0xc90] sm:$0xff]  ;;  %1032 = vmatpush.msrb.mxu1 %v406_v59  ;;  %v159_v59 = vld [vmem:[#allocation5 + $0x318] sm:$0xff] }
 0x11c   :  { %v530_v61 = vld [vmem:[#allocation5 + $0xeb0] sm:$0xff]  ;;  %1054 = vmatpush.msrb.mxu2 %v462_v60  ;;  %v215_v60 = vld [vmem:[#allocation5 + $0x4d8] sm:$0xff] }
 0x11d   :  { %v334_v63 = vld [vmem:[#allocation5 + $0x890] sm:$0xff]  ;;  %1073 = vmatpush.msrb.mxu3 %v530_v61  ;;  %v283_v61 = vld [vmem:[#allocation5 + $0x6f8] sm:$0xff] }
 0x11e   :  { %v402_v0 = vld [vmem:[#allocation5 + $0xab0] sm:$0xff]  ;;  %1014 = vmatpush.msrb.mxu0 %v334_v63  ;;  %v87_v63 = vld [vmem:[#allocation5 + $0xd8] sm:$0xff] }
 0x11f   :  { %v458_v1 = vld [vmem:[#allocation5 + $0xc70] sm:$0xff]  ;;  %1033 = vmatpush.msrb.mxu1 %v402_v0  ;;  %v155_v0 = vld [vmem:[#allocation5 + $0x2f8] sm:$0xff] }
 0x120   :  { %v526_v2 = vld [vmem:[#allocation5 + $0xe90] sm:$0xff]  ;;  %1055 = vmatpush.msrb.mxu2 %v458_v1  ;;  %v211_v1 = vld [vmem:[#allocation5 + $0x4b8] sm:$0xff] }
 0x121   :  { %v330_v5 = vld [vmem:[#allocation5 + $0x870] sm:$0xff]  ;;  %1074 = vmatpush.msrb.mxu3 %v526_v2  ;;  %v279_v2 = vld [vmem:[#allocation5 + $0x6d8] sm:$0xff] }
 0x122   :  { %v398_v6 = vld [vmem:[#allocation5 + $0xa90] sm:$0xff]  ;;  %1015 = vmatpush.msrb.mxu0 %v330_v5  ;;  %v83_v5 = vld [vmem:[#allocation5 + $0xb8] sm:$0xff] }
 0x123   :  { %v454_v7 = vld [vmem:[#allocation5 + $0xc50] sm:$0xff]  ;;  %1034 = vmatpush.msrb.mxu1 %v398_v6  ;;  %v151_v6 = vld [vmem:[#allocation5 + $0x2d8] sm:$0xff] }
 0x124   :  { %v522_v8 = vld [vmem:[#allocation5 + $0xe70] sm:$0xff]  ;;  %1056 = vmatpush.msrb.mxu2 %v454_v7  ;;  %v207_v7 = vld [vmem:[#allocation5 + $0x498] sm:$0xff] }
 0x125   :  { %v326_v9 = vld [vmem:[#allocation5 + $0x850] sm:$0xff]  ;;  %1075 = vmatpush.msrb.mxu3 %v522_v8  ;;  %v275_v8 = vld [vmem:[#allocation5 + $0x6b8] sm:$0xff] }
 0x126   :  { %v394_v11 = vld [vmem:[#allocation5 + $0xa70] sm:$0xff]  ;;  %1016 = vmatpush.msrb.mxu0 %v326_v9  ;;  %v79_v9 = vld [vmem:[#allocation5 + $0x98] sm:$0xff] }
 0x127   :  { %v450_v12 = vld [vmem:[#allocation5 + $0xc30] sm:$0xff]  ;;  %1035 = vmatpush.msrb.mxu1 %v394_v11  ;;  %v147_v11 = vld [vmem:[#allocation5 + $0x2b8] sm:$0xff] }
 0x128   :  { %v518_v13 = vld [vmem:[#allocation5 + $0xe50] sm:$0xff]  ;;  %1057 = vmatpush.msrb.mxu2 %v450_v12  ;;  %v203_v12 = vld [vmem:[#allocation5 + $0x478] sm:$0xff] }
 0x129   :  { %v322_v62 = vld [vmem:[#allocation5 + $0x830] sm:$0xff]  ;;  %1076 = vmatpush.msrb.mxu3 %v518_v13  ;;  %v271_v13 = vld [vmem:[#allocation5 + $0x698] sm:$0xff] }
 0x12a   :  { %v390_v14 = vld [vmem:[#allocation5 + $0xa50] sm:$0xff]  ;;  %1017 = vmatpush.msrb.mxu0 %v322_v62  ;;  %v75_v62 = vld [vmem:[#allocation5 + $0x78] sm:$0xff] }
 0x12b   :  { %v446_v15 = vld [vmem:[#allocation5 + $0xc10] sm:$0xff]  ;;  %1036 = vmatpush.msrb.mxu1 %v390_v14  ;;  %v143_v14 = vld [vmem:[#allocation5 + $0x298] sm:$0xff] }
 0x12c   :  { %v514_v16 = vld [vmem:[#allocation5 + $0xe30] sm:$0xff]  ;;  %1058 = vmatpush.msrb.mxu2 %v446_v15  ;;  %v199_v15 = vld [vmem:[#allocation5 + $0x458] sm:$0xff] }
 0x12d   :  { %v318_v3 = vld [vmem:[#allocation5 + $0x810] sm:$0xff]  ;;  %1077 = vmatpush.msrb.mxu3 %v514_v16  ;;  %1059 = vmatmul.f32.vlgmr.msrb.gmra.mxu2 %v1471_v29  ;;  %v267_v16 = vld [vmem:[#allocation5 + $0x678] sm:$0xff] }
 0x12e   :  { %v386_v17 = vld [vmem:[#allocation5 + $0xa30] sm:$0xff]  ;;  %1018 = vmatpush.msrb.mxu0 %v318_v3  ;;  %1123 = vmatpush.msra.mxu2 %v251_v4  ;;  %v71_v3 = vld [vmem:[#allocation5 + $0x58] sm:$0xff] }
 0x12f   :  { %v510_v19 = vld [vmem:[#allocation5 + $0xe10] sm:$0xff]  ;;  %1037 = vmatpush.msrb.mxu1 %v386_v17  ;;  %1019 = vmatmul.f32.vlgmr.msrb.gmra.mxu0 %v1474_v42  ;;  %v139_v4 = vld [vmem:[#allocation5 + $0x278] sm:$0xff] }
 0x130   :  { %1078 = vmatpush.msrb.mxu3 %v510_v19  ;;  %v382_v26 = vld [vmem:[#allocation5 + $0xa10] sm:$0xff]  ;;  %1083 = vmatpush.msra.mxu0 %v123_v20  ;;  %v195_v17 = vld [vmem:[#allocation5 + $0x438] sm:$0xff] }
 0x131   :  { %1124 = vmatpush.msra.mxu2 %v247_v21  ;;  %1038 = vmatpush.msrb.mxu1 %v382_v26  ;;  %v1468_v33 = vld.sshfl [vmem:[#allocation1 + $0x8] sm:$0xff pattern:$0x73625140]  ;;  %v263_v19 = vld [vmem:[#allocation5 + $0x658] sm:$0xff] }
 0x132   :  { %1143 = vmatpush.msra.mxu3 %v315_v22  ;;  %1084 = vmatpush.msra.mxu0 %v119_v27  ;;  %v1480_v49 = vld.sshfl [vmem:[#allocation1 + $0x28] sm:$0xff pattern:$0x73625140]  ;;  %v67_v20 = vld [vmem:[#allocation5 + $0x38] sm:$0xff] }
 0x133   :  { %959 = vmatmul.f32.vlgmr.msra.gmra.mxu1 %v1468_v33  ;;  %1125 = vmatpush.msra.mxu2 %v243_v18  ;;  %v135_v21 = vld [vmem:[#allocation5 + $0x258] sm:$0xff] }
 0x134   :  { %1103 = vmatpush.msra.mxu1 %v187_v30  ;;  %1144 = vmatpush.msra.mxu3 %v311_v31  ;;  %v191_v22 = vld [vmem:[#allocation5 + $0x418] sm:$0xff] }
 0x135   :  { %1085 = vmatpush.msra.mxu0 %v115_v32  ;;  %1126 = vmatpush.msra.mxu2 %v239_v23  ;;  %v259_v26 = vld [vmem:[#allocation5 + $0x638] sm:$0xff] }
 0x136   :  { %1104 = vmatpush.msra.mxu1 %v183_v24  ;;  %1145 = vmatpush.msra.mxu3 %v307_v34  ;;  %v507_v27 = vld [vmem:[#allocation5 + $0xdf8] sm:$0xff] }
 0x137   :  { %1086 = vmatpush.msra.mxu0 %v111_v35  ;;  %1127 = vmatpush.msra.mxu2 %v235_v37  ;;  %v63_v18 = vld [vmem:[#allocation5 + $0x18] sm:$0xff] }
 0x138   :  { %1105 = vmatpush.msra.mxu1 %v179_v36  ;;  %1146 = vmatpush.msra.mxu3 %v303_v38  ;;  %v131_v30 = vld [vmem:[#allocation5 + $0x238] sm:$0xff] }
 0x139   :  { %1079 = vmatmul.f32.vlgmr.msrb.gmra.mxu3 %v1477_v44  ;;  %1087 = vmatpush.msra.mxu0 %v107_v39  ;;  %v255_v31 = vld [vmem:[#allocation5 + $0x618] sm:$0xff] }
 0x13a   :  { %1106 = vmatpush.msra.mxu1 %v175_v40  ;;  %1128 = vmatpush.msra.mxu2 %v231_v41  ;;  %v379_v32 = vld [vmem:[#allocation5 + $0x9f8] sm:$0xff] }
 0x13b   :  { %1147 = vmatpush.msra.mxu3 %v299_v43  ;;  %1039 = vmatmul.f32.vlgmr.msrb.gmra.mxu1 %v1480_v49  ;;  %v503_v23 = vld [vmem:[#allocation5 + $0xdd8] sm:$0xff] }
 0x13c   :  { %1088 = vmatpush.msra.mxu0 %v103_v45  ;;  %1107 = vmatpush.msra.mxu1 %v171_v46  ;;  %v571_v24 = vld [vmem:[#allocation5 + $0xff8] sm:$0xff] }
 0x13d   :  { %1129 = vmatpush.msra.mxu2 %v227_v47  ;;  %1148 = vmatpush.msra.mxu3 %v295_v48  ;;  %v127_v34 = vld [vmem:[#allocation5 + $0x218] sm:$0xff] }
 0x13e   :  { %1089 = vmatpush.msra.mxu0 %v99_v50  ;;  %1108 = vmatpush.msra.mxu1 %v167_v51  ;;  %v375_v35 = vld [vmem:[#allocation5 + $0x9d8] sm:$0xff] }
 0x13f   :  { %1130 = vmatpush.msra.mxu2 %v223_v52  ;;  %1149 = vmatpush.msra.mxu3 %v291_v53  ;;  %v443_v36 = vld [vmem:[#allocation5 + $0xbf8] sm:$0xff] }
 0x140   :  { %1090 = vmatpush.msra.mxu0 %v95_v54  ;;  %1109 = vmatpush.msra.mxu1 %v163_v55  ;;  %v499_v37 = vld [vmem:[#allocation5 + $0xdb8] sm:$0xff] }
 0x141   :  { %1131 = vmatpush.msra.mxu2 %v219_v56  ;;  %1150 = vmatpush.msra.mxu3 %v287_v57  ;;  %v567_v38 = vld [vmem:[#allocation5 + $0xfd8] sm:$0xff] }
 0x142   :  { %1091 = vmatpush.msra.mxu0 %v91_v58  ;;  %1110 = vmatpush.msra.mxu1 %v159_v59  ;;  %v371_v39 = vld [vmem:[#allocation5 + $0x9b8] sm:$0xff] }
 0x143   :  { %1132 = vmatpush.msra.mxu2 %v215_v60  ;;  %1151 = vmatpush.msra.mxu3 %v283_v61  ;;  %v439_v40 = vld [vmem:[#allocation5 + $0xbd8] sm:$0xff] }
 0x144   :  { %1092 = vmatpush.msra.mxu0 %v87_v63  ;;  %1111 = vmatpush.msra.mxu1 %v155_v0  ;;  %v495_v41 = vld [vmem:[#allocation5 + $0xd98] sm:$0xff] }
 0x145   :  { %1133 = vmatpush.msra.mxu2 %v211_v1  ;;  %1152 = vmatpush.msra.mxu3 %v279_v2  ;;  %v563_v43 = vld [vmem:[#allocation5 + $0xfb8] sm:$0xff] }
 0x146   :  { %1093 = vmatpush.msra.mxu0 %v83_v5  ;;  %1112 = vmatpush.msra.mxu1 %v151_v6  ;;  %v367_v45 = vld [vmem:[#allocation5 + $0x998] sm:$0xff] }
 0x147   :  { %1134 = vmatpush.msra.mxu2 %v207_v7  ;;  %1153 = vmatpush.msra.mxu3 %v275_v8  ;;  %v435_v46 = vld [vmem:[#allocation5 + $0xbb8] sm:$0xff] }
 0x148   :  { %1094 = vmatpush.msra.mxu0 %v79_v9  ;;  %1113 = vmatpush.msra.mxu1 %v147_v11  ;;  %v491_v47 = vld [vmem:[#allocation5 + $0xd78] sm:$0xff] }
 0x149   :  { %1135 = vmatpush.msra.mxu2 %v203_v12  ;;  %1154 = vmatpush.msra.mxu3 %v271_v13  ;;  %v559_v48 = vld [vmem:[#allocation5 + $0xf98] sm:$0xff] }
 0x14a   :  { %1095 = vmatpush.msra.mxu0 %v75_v62  ;;  %1114 = vmatpush.msra.mxu1 %v143_v14  ;;  %v363_v50 = vld [vmem:[#allocation5 + $0x978] sm:$0xff] }
 0x14b   :  { %1136 = vmatpush.msra.mxu2 %v199_v15  ;;  %1155 = vmatpush.msra.mxu3 %v267_v16  ;;  %v431_v51 = vld [vmem:[#allocation5 + $0xb98] sm:$0xff] }
 0x14c   :  { %1096 = vmatpush.msra.mxu0 %v71_v3  ;;  %1115 = vmatpush.msra.mxu1 %v139_v4  ;;  %v487_v52 = vld [vmem:[#allocation5 + $0xd58] sm:$0xff] }
 0x14d   :  { %1137 = vmatpush.msra.mxu2 %v195_v17  ;;  %1156 = vmatpush.msra.mxu3 %v263_v19  ;;  %v555_v53 = vld [vmem:[#allocation5 + $0xf78] sm:$0xff] }
 0x14e   :  { %1097 = vmatpush.msra.mxu0 %v67_v20  ;;  %1116 = vmatpush.msra.mxu1 %v135_v21  ;;  %v359_v54 = vld [vmem:[#allocation5 + $0x958] sm:$0xff] }
 0x14f   :  { %1138 = vmatpush.msra.mxu2 %v191_v22  ;;  %1157 = vmatpush.msra.mxu3 %v259_v26  ;;  %v427_v55 = vld [vmem:[#allocation5 + $0xb78] sm:$0xff] }
 0x150   :  { %1098 = vmatpush.msra.mxu0 %v63_v18  ;;  %1117 = vmatpush.msra.mxu1 %v131_v30  ;;  %v483_v56 = vld [vmem:[#allocation5 + $0xd38] sm:$0xff] }
 0x151   :  { %1203 = vmatpush.msrb.mxu2 %v507_v27  ;;  %1158 = vmatpush.msra.mxu3 %v255_v31  ;;  %v551_v57 = vld [vmem:[#allocation5 + $0xf58] sm:$0xff] }
 0x152   :  { %1163 = vmatpush.msrb.mxu0 %v379_v32  ;;  %1118 = vmatpush.msra.mxu1 %v127_v34  ;;  %v355_v58 = vld [vmem:[#allocation5 + $0x938] sm:$0xff] }
 0x153   :  { %1204 = vmatpush.msrb.mxu2 %v503_v23  ;;  %1223 = vmatpush.msrb.mxu3 %v571_v24  ;;  %v423_v59 = vld [vmem:[#allocation5 + $0xb58] sm:$0xff] }
 0x154   :  { %1164 = vmatpush.msrb.mxu0 %v375_v35  ;;  %1183 = vmatpush.msrb.mxu1 %v443_v36  ;;  %v479_v60 = vld [vmem:[#allocation5 + $0xd18] sm:$0xff]  ;;  %v640_v36 = vpop.f32.mrf.mxu1 }
 0x155   :  { %1205 = vmatpush.msrb.mxu2 %v499_v37  ;;  %1224 = vmatpush.msrb.mxu3 %v567_v38  ;;  %v547_v61 = vld [vmem:[#allocation5 + $0xf38] sm:$0xff]  ;;  %v660_v37 = vpop.f32.mrf.mxu2  ;;  %v680_v38 = vpop.f32.mrf.mxu3 }
 0x156   :  { %1165 = vmatpush.msrb.mxu0 %v371_v39  ;;  %1184 = vmatpush.msrb.mxu1 %v439_v40  ;;  %v351_v63 = vld [vmem:[#allocation5 + $0x918] sm:$0xff] }
 0x157   :  { %1206 = vmatpush.msrb.mxu2 %v495_v41  ;;  %1225 = vmatpush.msrb.mxu3 %v563_v43  ;;  %v419_v0 = vld [vmem:[#allocation5 + $0xb38] sm:$0xff] }
 0x158   :  { %1166 = vmatpush.msrb.mxu0 %v367_v45  ;;  %1185 = vmatpush.msrb.mxu1 %v435_v46  ;;  %v475_v1 = vld [vmem:[#allocation5 + $0xcf8] sm:$0xff] }
 0x159   :  { %1207 = vmatpush.msrb.mxu2 %v491_v47  ;;  %1226 = vmatpush.msrb.mxu3 %v559_v48  ;;  %v543_v2 = vld [vmem:[#allocation5 + $0xf18] sm:$0xff] }
 0x15a   :  { %1167 = vmatpush.msrb.mxu0 %v363_v50  ;;  %1186 = vmatpush.msrb.mxu1 %v431_v51  ;;  %v347_v5 = vld [vmem:[#allocation5 + $0x8f8] sm:$0xff] }
 0x15b   :  { %1208 = vmatpush.msrb.mxu2 %v487_v52  ;;  %1227 = vmatpush.msrb.mxu3 %v555_v53  ;;  %v415_v6 = vld [vmem:[#allocation5 + $0xb18] sm:$0xff] }
 0x15c   :  { %1168 = vmatpush.msrb.mxu0 %v359_v54  ;;  %1187 = vmatpush.msrb.mxu1 %v427_v55  ;;  %v471_v7 = vld [vmem:[#allocation5 + $0xcd8] sm:$0xff]  ;;  %v720_v40 = vpop.f32.mrf.mxu1 }
 0x15d   :  { %1209 = vmatpush.msrb.mxu2 %v483_v56  ;;  %1228 = vmatpush.msrb.mxu3 %v551_v57  ;;  %v539_v8 = vld [vmem:[#allocation5 + $0xef8] sm:$0xff]  ;;  %v740_v41 = vpop.f32.mrf.mxu2  ;;  %v1491_v43 = vpop.f32.mrf.mxu3 }
 0x15e   :  { %1169 = vmatpush.msrb.mxu0 %v355_v58  ;;  %1188 = vmatpush.msrb.mxu1 %v423_v59  ;;  %v343_v9 = vld [vmem:[#allocation5 + $0x8d8] sm:$0xff] }
 0x15f   :  { %1210 = vmatpush.msrb.mxu2 %v479_v60  ;;  %1229 = vmatpush.msrb.mxu3 %v547_v61  ;;  %v411_v11 = vld [vmem:[#allocation5 + $0xaf8] sm:$0xff] }
 0x160   :  { %1170 = vmatpush.msrb.mxu0 %v351_v63  ;;  %1189 = vmatpush.msrb.mxu1 %v419_v0  ;;  %v467_v12 = vld [vmem:[#allocation5 + $0xcb8] sm:$0xff] }
 0x161   :  { %1211 = vmatpush.msrb.mxu2 %v475_v1  ;;  %1230 = vmatpush.msrb.mxu3 %v543_v2  ;;  %v535_v13 = vld [vmem:[#allocation5 + $0xed8] sm:$0xff] }
 0x162   :  { %1171 = vmatpush.msrb.mxu0 %v347_v5  ;;  %1190 = vmatpush.msrb.mxu1 %v415_v6  ;;  %v339_v62 = vld [vmem:[#allocation5 + $0x8b8] sm:$0xff] }
 0x163   :  { %1212 = vmatpush.msrb.mxu2 %v471_v7  ;;  %1231 = vmatpush.msrb.mxu3 %v539_v8  ;;  %v407_v14 = vld [vmem:[#allocation5 + $0xad8] sm:$0xff] }
 0x164   :  { %1172 = vmatpush.msrb.mxu0 %v343_v9  ;;  %1191 = vmatpush.msrb.mxu1 %v411_v11  ;;  %v463_v15 = vld [vmem:[#allocation5 + $0xc98] sm:$0xff]  ;;  %v800_v45 = vpop.f32.mrf.mxu1 }
 0x165   :  { %v531_v16 = vld [vmem:[#allocation5 + $0xeb8] sm:$0xff]  ;;  %1213 = vmatpush.msrb.mxu2 %v467_v12  ;;  %1232 = vmatpush.msrb.mxu3 %v535_v13  ;;  %v820_v46 = vpop.f32.mrf.mxu2  ;;  %v840_v47 = vpop.f32.mrf.mxu3 }
 0x166   :  { %v335_v3 = vld [vmem:[#allocation5 + $0x898] sm:$0xff]  ;;  %1173 = vmatpush.msrb.mxu0 %v339_v62  ;;  %1192 = vmatpush.msrb.mxu1 %v407_v14 }
 0x167   :  { %v403_v4 = vld [vmem:[#allocation5 + $0xab8] sm:$0xff]  ;;  %1214 = vmatpush.msrb.mxu2 %v463_v15  ;;  %1233 = vmatpush.msrb.mxu3 %v531_v16 }
 0x168   :  { %v459_v17 = vld [vmem:[#allocation5 + $0xc78] sm:$0xff]  ;;  %1139 = vmatmul.f32.vlgmr.msra.gmra.mxu2 %v1459_v10  ;;  %1174 = vmatpush.msrb.mxu0 %v335_v3 }
 0x169   :  { %v527_v19 = vld [vmem:[#allocation5 + $0xe98] sm:$0xff]  ;;  %1193 = vmatpush.msrb.mxu1 %v403_v4  ;;  %1215 = vmatpush.msrb.mxu2 %v459_v17 }
 0x16a   :  { %v331_v20 = vld [vmem:[#allocation5 + $0x878] sm:$0xff]  ;;  %1234 = vmatpush.msrb.mxu3 %v527_v19  ;;  %1099 = vmatmul.f32.vlgmr.msra.gmra.mxu0 %v1462_v25 }
 0x16b   :  { %v399_v21 = vld [vmem:[#allocation5 + $0xa98] sm:$0xff]  ;;  %1159 = vmatmul.f32.vlgmr.msra.gmra.mxu3 %v1465_v28  ;;  %1175 = vmatpush.msrb.mxu0 %v331_v20 }
 0x16c   :  { %v455_v22 = vld [vmem:[#allocation5 + $0xc58] sm:$0xff]  ;;  %1194 = vmatpush.msrb.mxu1 %v399_v21 }
 0x16d   :  { %v523_v26 = vld [vmem:[#allocation5 + $0xe78] sm:$0xff]  ;;  %1216 = vmatpush.msrb.mxu2 %v455_v22  ;;  %1119 = vmatmul.f32.vlgmr.msra.gmra.mxu1 %v1468_v33  ;;  %v620_v33 = vpop.f32.mrf.mxu0  ;;  %v900_v50 = vpop.f32.mrf.mxu2 }
 0x16e   :  { %v327_v27 = vld [vmem:[#allocation5 + $0x858] sm:$0xff]  ;;  %1235 = vmatpush.msrb.mxu3 %v523_v26  ;;  %v920_v52 = vpop.f32.mrf.mxu3 }
 0x16f   :  { %v395_v18 = vld [vmem:[#allocation5 + $0xa78] sm:$0xff]  ;;  %1176 = vmatpush.msrb.mxu0 %v327_v27 }
 0x170   :  { %v451_v30 = vld [vmem:[#allocation5 + $0xc38] sm:$0xff]  ;;  %1195 = vmatpush.msrb.mxu1 %v395_v18 }
 0x171   :  { %v519_v31 = vld [vmem:[#allocation5 + $0xe58] sm:$0xff]  ;;  %1217 = vmatpush.msrb.mxu2 %v451_v30 }
 0x172   :  { %v323_v10 = vld [vmem:[#allocation5 + $0x838] sm:$0xff]  ;;  %1236 = vmatpush.msrb.mxu3 %v519_v31 }
 0x173   :  { %v391_v32 = vld [vmem:[#allocation5 + $0xa58] sm:$0xff]  ;;  %1177 = vmatpush.msrb.mxu0 %v323_v10 }
 0x174   :  { %v447_v23 = vld [vmem:[#allocation5 + $0xc18] sm:$0xff]  ;;  %1196 = vmatpush.msrb.mxu1 %v391_v32 }
 0x175   :  { %v515_v24 = vld [vmem:[#allocation5 + $0xe38] sm:$0xff]  ;;  %1218 = vmatpush.msrb.mxu2 %v447_v23  ;;  %v700_v39 = vpop.f32.mrf.mxu0 }
 0x176   :  { %v319_v25 = vld [vmem:[#allocation5 + $0x818] sm:$0xff]  ;;  %1237 = vmatpush.msrb.mxu3 %v515_v24  ;;  %1219 = vmatmul.f32.vlgmr.msrb.gmra.mxu2 %v1471_v29 }
 0x177   :  { %v387_v28 = vld [vmem:[#allocation5 + $0xa38] sm:$0xff]  ;;  %1178 = vmatpush.msrb.mxu0 %v319_v25 }
 0x178   :  { %v511_v34 = vld [vmem:[#allocation5 + $0xe18] sm:$0xff]  ;;  %1197 = vmatpush.msrb.mxu1 %v387_v28  ;;  %1179 = vmatmul.f32.vlgmr.msrb.gmra.mxu0 %v1474_v42  ;;  %v880_v42 = vpop.f32.mrf.mxu1 }
 0x179   :  { %v383_v35 = vld [vmem:[#allocation5 + $0xa18] sm:$0xff]  ;;  %1238 = vmatpush.msrb.mxu3 %v511_v34 }
 0x17a   :  { %1239 = vmatmul.f32.vlgmr.msrb.gmra.mxu3 %v1477_v44  ;;  %1198 = vmatpush.msrb.mxu1 %v383_v35  ;;  %v572_v44 = vld [vmem:[#allocation7] sm:$0xf] }
 0x17b   :  { %1199 = vmatmul.f32.vlgmr.msrb.gmra.mxu1 %v1480_v49  ;;  %v575_v51 = vperm.slane %v572_v44, 1  ;;  %v576_v53 = vperm.slane %v572_v44, 2  ;;  %v574_v57 = vperm.slane %v572_v44, 0  ;;  %v577_v9 = vperm.slane %v572_v44, 3 }
 0x17d   :  { %v780_v29 = vpop.f32.mrf.mxu0  ;;  %v621_v61 = vadd.f32 %v620_v33, %v574_v57 }
 0x17e   :  { %v781_v54 = vadd.f32 %v780_v29, %v575_v51 }
 0x17f   :  { %v641_v2 = vadd.f32 %v640_v36, %v621_v61 }
 0x180   :  { %v980_v56 = vpop.f32.mrf.mxu2  ;;  %v801_v59 = vadd.f32 %v800_v45, %v781_v54 }
 0x181   :  { %v1000_v60 = vpop.f32.mrf.mxu3  ;;  %v661_v11 = vadd.f32 %v660_v37, %v641_v2 }
 0x182   :  { %v821_v1 = vadd.f32 %v820_v46, %v801_v59 }
 0x183   :  { %v681_v16 = vadd.f32 %v680_v38, %v661_v11 }
 0x184   :  { %v841_v8 = vadd.f32 %v840_v47, %v821_v1 }
 0x185   :  { %v860_v48 = vpop.f32.mrf.mxu0  ;;  %v701_v22 = vadd.f32 %v700_v39, %v681_v16 }
 0x186   :  { %v861_v14 = vadd.f32 %v860_v48, %v841_v8 }
 0x187   :  { %v721_v10 = vadd.f32 %v720_v40, %v701_v22 }
 0x188   :  { %v881_v20 = vadd.f32 %v880_v42, %v861_v14 }
 0x189   :  { %v741_v35 = vadd.f32 %v740_v41, %v721_v10 }
 0x18a   :  { %v901_v30 = vadd.f32 %v900_v50, %v881_v20 }
 0x18b   :  { %v761_v39 = vadd.f32 %v1491_v43, %v741_v35 }
 0x18c   :  { %v921_v25 = vadd.f32 %v920_v52, %v901_v30 }
 0x18d   :  { %v940_v49 = vpop.f32.mrf.mxu0 }
 0x18e   :  { %v941_v58 = vadd.f32 %v940_v49, %v576_v53  ;;  %v1247_v38 = vrot.slane %v921_v25, 6 }
 0x190   :  { %v1251_v46 = vsel %vm1250_vm0, %v761_v39, %v1247_v38 }
 0x1ac   :  { %v1020_v0 = vpop.f32.mrf.mxu0 }
 0x1b0   :  { %v960_v55 = vpop.f32.mrf.mxu1  ;;  %v1060_v7 = vpop.f32.mrf.mxu2 }
 0x1b1   :  { %v961_v63 = vadd.f32 %v960_v55, %v941_v58 }
 0x1b3   :  { %v981_v5 = vadd.f32 %v980_v56, %v961_v63 }
 0x1b5   :  { %v1001_v12 = vadd.f32 %v1000_v60, %v981_v5 }
 0x1b7   :  { %v1021_v3 = vadd.f32 %v1020_v0, %v1001_v12 }
 0x1b8   :  { %v1040_v6 = vpop.f32.mrf.mxu1 }
 0x1b9   :  { %v1041_v26 = vadd.f32 %v1040_v6, %v1021_v3 }
 0x1bb   :  { %v1061_v32 = vadd.f32 %v1060_v7, %v1041_v26 }
 0x1bc   :  { %v1080_v13 = vpop.f32.mrf.mxu3 }
 0x1bd   :  { %v1081_v33 = vadd.f32 %v1080_v13, %v1061_v32 }
 0x1bf   :  { %v1248_v40 = vrot.slane %v1081_v33, 4 }
 0x1e7   :  { %v1100_v62 = vpop.f32.mrf.mxu0 }
 0x1e8   :  { %v1101_v15 = vadd.f32 %v1100_v62, %v577_v9 }
 0x1ea   :  { %v1120_v4 = vpop.f32.mrf.mxu1 }
 0x1eb   :  { %v1121_v17 = vadd.f32 %v1120_v4, %v1101_v15  ;;  %v1140_v19 = vpop.f32.mrf.mxu2 }
 0x1ed   :  { %v1141_v21 = vadd.f32 %v1140_v19, %v1121_v17 }
 0x1ee   :  { %v1160_v27 = vpop.f32.mrf.mxu3 }
 0x1ef   :  { %v1161_v18 = vadd.f32 %v1160_v27, %v1141_v21 }
 0x1f5   :  { %v1180_v31 = vpop.f32.mrf.mxu0 }
 0x1f6   :  { %v1181_v23 = vadd.f32 %v1180_v31, %v1161_v18 }
 0x1f8   :  { %v1200_v24 = vpop.f32.mrf.mxu1 }
 0x1f9   :  { %v1201_v28 = vadd.f32 %v1200_v24, %v1181_v23  ;;  %v1220_v34 = vpop.f32.mrf.mxu2 }
 0x1fb   :  { %v1221_v36 = vadd.f32 %v1220_v34, %v1201_v28 }
 0x1fd   :  { %v1240_v37 = vpop.f32.mrf.mxu3 }
 0x1fe   :  { %v1241_v29 = vadd.f32 %v1240_v37, %v1221_v36 }
 0x200   :  { %v1249_v45 = vrot.slane %v1241_v29, 2 }
 0x202   :  { %v1253_v41 = vsel %vm1252_vm1, %v1248_v40, %v1249_v45 }
 0x203   :  { %v1255_v47 = vsel %vm1254_vm2, %v1251_v46, %v1253_v41 }
 0x204   :  { %1257 = vst [vmem:[#allocation8] sm:$0xff] %v1255_v47 }
 0x205   :  { %1268 = dma.vmem_to_hbm [thread:$0]  %s1264_s2, 128, %s1266_s30, [#allocation4]  }
 0x206   :  { %1390 = dma.done.wait [#allocation4], 128  }
 0x207   :  { %1391 = vsyncadd [#allocation4], 4294967168 }
 0x208   :  { %1273 = vsyncpa [#allocation3], 1 }
 0x209   :  { %1274 = vsyncpa [#allocation6], 1 }
 0x20a   :  { %1275 = vsyncpa [#allocation4], 1 }

</bundles_post_ra>
